<compile_context>
chip_gen: v6e
topology: v6e:2x2x1
jax: 0.10.0
libtpu: 0.0.40
codegen_flags: <defaults>
</compile_context>

<pallas_src>
import functools

import jax
import jax.numpy as jnp
from jax.experimental import pallas as pl
from jax.experimental.pallas import tpu as pltpu

KSIZE = 3
TAPS = KSIZE * KSIZE
HALO = 128            # lane halo around the flat pixel axis (keeps tap slices in bounds
                      # and makes the hidden-activation interior store lane-aligned)


def _round8(n):
    return ((n + 7) // 8) * 8


# ----------------------------------------------------------------------------
# Fused generator kernel: 3x (conv3x3 + activation), fully VMEM-resident.
# ----------------------------------------------------------------------------
def _generator_kernel(mask_ref, x_ref, w1_ref, w2_ref, w3_ref,
                      b1_ref, b2_ref, b3_ref, o_ref,
                      apad_ref, slab_ref, *, Mp, Wp, CP, F):
    """One full generator per grid step (grid axis = which generator).

    mask_ref : (1, Mp)              f32   1.0 at interior pixels, 0.0 at spatial padding
    x_ref    : (1, CP, H+Mp+H)      bf16  channel-padded, spatially-padded, flattened,
                                          halo-padded input (H = HALO lanes each side)
    w*_ref   : (1, cout, 9*cin)     bf16  folded conv weights (tap-major, channel-minor)
    b*_ref   : (1, cout, 1)         f32
    o_ref    : (1, CP, Mp)          f32   tanh output (lane-dense; wrapper unpads)
    apad_ref : (F, HALO+Mp+HALO)    bf16  VMEM scratch, flat padded hidden activation
    slab_ref : (9*max(CP,F), Mp)    bf16  VMEM scratch, im2col slab (dot RHS)
    """
    mask = mask_ref[...]                                    # (1, Mp) f32
    offs = [(di - 1) * Wp + (dj - 1)
            for di in range(KSIZE) for dj in range(KSIZE)]  # flat tap offsets

    def build_slab(load, cin):
        # 9 statically-shifted lane slices of the flat padded source -> slab rows.
        for k, off in enumerate(offs):
            slab_ref[k * cin:(k + 1) * cin, :] = load(HALO + off)

    def conv(w_ref, b_ref, K):
        # Single MXU dot with contraction depth K = 9*cin, f32 accumulate.
        acc = jnp.dot(w_ref[0], slab_ref[:K, :],
                      preferred_element_type=jnp.float32)   # (cout, Mp)
        return acc + b_ref[0]                               # (cout, 1) broadcast

    # Zero only the halo of the hidden-activation scratch; the interior is always
    # fully overwritten (no full-buffer zeroing passes).
    apad_ref[:, :HALO] = jnp.zeros((F, HALO), jnp.bfloat16)
    apad_ref[:, HALO + Mp:] = jnp.zeros((F, HALO), jnp.bfloat16)

    # conv1 (CP -> F) + ReLU; mask zeroes the spatial-padding pixel columns so the
    # next conv sees proper zero padding.
    build_slab(lambda s: x_ref[0, :, s:s + Mp], CP)
    h = jnp.maximum(conv(w1_ref, b1_ref, TAPS * CP), 0.0) * mask
    apad_ref[:, HALO:HALO + Mp] = h.astype(jnp.bfloat16)

    # conv2 (F -> F) + ReLU
    build_slab(lambda s: apad_ref[:, s:s + Mp], F)
    h = jnp.maximum(conv(w2_ref, b2_ref, TAPS * F), 0.0) * mask
    apad_ref[:, HALO:HALO + Mp] = h.astype(jnp.bfloat16)

    # conv3 (F -> CP) + Tanh: the only HBM write (lane-dense, Mp lanes).
    build_slab(lambda s: apad_ref[:, s:s + Mp], F)
    o_ref[0] = jnp.tanh(conv(w3_ref, b3_ref, TAPS * F)).astype(o_ref.dtype)


def _run_both_generators(mask, xs, p, *, Mp, Wp, CP, F):
    """xs: (2, CP, HALO+Mp+HALO) bf16 (both generators stacked) -> (2, CP, Mp) f32."""
    Lpad = xs.shape[-1]
    kernel = functools.partial(_generator_kernel, Mp=Mp, Wp=Wp, CP=CP, F=F)

    flops = 2 * 2 * Mp * TAPS * (CP * F + F * F + F * CP)
    bytes_accessed = (xs.size * 2 + mask.size * 4
                      + (p["W1"].size + p["W2"].size + p["W3"].size) * 2
                      + (p["B1"].size + p["B2"].size + p["B3"].size) * 4
                      + 2 * CP * Mp * 4)

    return pl.pallas_call(
        kernel,
        out_shape=jax.ShapeDtypeStruct((2, CP, Mp), jnp.float32),
        grid_spec=pltpu.PrefetchScalarGridSpec(
            num_scalar_prefetch=0,
            grid=(2,),                                               # generator index
            in_specs=[
                pl.BlockSpec((1, Mp), lambda g: (0, 0)),             # interior mask (shared)
                pl.BlockSpec((1, CP, Lpad), lambda g: (g, 0, 0)),    # padded flat input
                pl.BlockSpec((1, F, TAPS * CP), lambda g: (g, 0, 0)),    # W1
                pl.BlockSpec((1, F, TAPS * F), lambda g: (g, 0, 0)),     # W2
                pl.BlockSpec((1, CP, TAPS * F), lambda g: (g, 0, 0)),    # W3
                pl.BlockSpec((1, F, 1), lambda g: (g, 0, 0)),            # B1
                pl.BlockSpec((1, F, 1), lambda g: (g, 0, 0)),            # B2
                pl.BlockSpec((1, CP, 1), lambda g: (g, 0, 0)),           # B3
            ],
            out_specs=pl.BlockSpec((1, CP, Mp), lambda g: (g, 0, 0)),
            scratch_shapes=[
                pltpu.VMEM((F, HALO + Mp + HALO), jnp.bfloat16),     # padded hidden act
                pltpu.VMEM((TAPS * max(CP, F), Mp), jnp.bfloat16),   # im2col slab
            ],
        ),
        compiler_params=pltpu.CompilerParams(
            dimension_semantics=("parallel",),       # one generator per core on v7x
            vmem_limit_bytes=32 * 1024 * 1024),
        cost_estimate=pl.CostEstimate(
            flops=flops, transcendentals=2 * Mp * CP,
            bytes_accessed=bytes_accessed),
    )(mask, xs, p["W1"], p["W2"], p["W3"], p["B1"], p["B2"], p["B3"])


# ----------------------------------------------------------------------------
# Parameter init (stand-in Generator) and static packing for the fused kernel
# ----------------------------------------------------------------------------
def init_conv_params(key, kh, kw, cin, cout):
    kw_, kb_ = jax.random.split(key)
    fan_in = kh * kw * cin
    w = jax.random.normal(kw_, (kh, kw, cin, cout), jnp.float32) * (fan_in ** -0.5)
    b = jax.random.normal(kb_, (cout,), jnp.float32) * 0.01
    return w, b


def init_generator_params(key, in_ch, out_ch, hidden):
    k1, k2, k3 = jax.random.split(key, 3)
    return {
        "c1": init_conv_params(k1, 3, 3, in_ch, hidden),
        "c2": init_conv_params(k2, 3, 3, hidden, hidden),
        "c3": init_conv_params(k3, 3, 3, hidden, out_ch),
    }


def init_cyclegan_params(key, in_channels, out_channels, hidden=8):
    k1, k2 = jax.random.split(key)
    return {
        "gen_SketchToReal": init_generator_params(k1, in_channels, out_channels, hidden),
        "gen_RealToSketch": init_generator_params(k2, out_channels, in_channels, hidden),
        # Discriminators are not used in CycleGAN.forward(); omitted here.
    }


def _pack_w(w, cin_p, cout_p):
    """(3,3,cin,cout) HWIO -> (cout_p, 9*cin_p) bf16, tap-major / channel-minor columns."""
    kh, kw, cin, cout = w.shape
    w = jnp.pad(w, ((0, 0), (0, 0), (0, cin_p - cin), (0, cout_p - cout)))
    w = w.reshape(kh * kw * cin_p, cout_p)            # row = tap*cin_p + c
    return jnp.transpose(w).astype(jnp.bfloat16)


def _pack_b(b, cout_p):
    return jnp.pad(b, (0, cout_p - b.shape[0])).reshape(cout_p, 1).astype(jnp.float32)


def pack_cyclegan_params(params, in_channels, out_channels, hidden):
    """Zero-pad channel widths to multiples of 8 and stack both generators so a
    single grid=(2,) pallas_call runs both.  Done once, statically."""
    CP = _round8(max(in_channels, out_channels))
    F = _round8(hidden)
    gens = (params["gen_SketchToReal"], params["gen_RealToSketch"])
    return {
        "W1": jnp.stack([_pack_w(g["c1"][0], CP, F) for g in gens]),
        "W2": jnp.stack([_pack_w(g["c2"][0], F, F) for g in gens]),
        "W3": jnp.stack([_pack_w(g["c3"][0], F, CP) for g in gens]),
        "B1": jnp.stack([_pack_b(g["c1"][1], F) for g in gens]),
        "B2": jnp.stack([_pack_b(g["c2"][1], F) for g in gens]),
        "B3": jnp.stack([_pack_b(g["c3"][1], CP) for g in gens]),
    }


# ----------------------------------------------------------------------------
# CycleGAN.forward  (fake_Real, fake_Sketch)
# ----------------------------------------------------------------------------
def cyclegan_forward(packed, x_sketch, x_real, *, in_channels, out_channels):
    F = packed["W1"].shape[1]                 # padded hidden width
    CP = packed["W1"].shape[2] // TAPS        # padded in/out channel width
    N, _, H, W = x_sketch.shape
    Hp, Wp = H + 2, W + 2
    Mp = N * Hp * Wp

    def prep(x_nchw, cin):
        x = x_nchw.astype(jnp.float32)
        x = jnp.pad(x, ((0, 0), (0, CP - cin), (1, 1), (1, 1)))    # channel + SAME pad
        x = jnp.transpose(x, (1, 0, 2, 3)).reshape(CP, Mp)         # channels x flat pixels
        x = jnp.pad(x, ((0, 0), (HALO, HALO)))                     # lane halo
        return x.astype(jnp.bfloat16)

    xs = jnp.stack([prep(x_sketch, in_channels),
                    prep(x_real, out_channels)], axis=0)           # (2, CP, HALO+Mp+HALO)

    m2d = jnp.zeros((Hp, Wp), jnp.float32).at[1:H + 1, 1:W + 1].set(1.0)
    mask = jnp.broadcast_to(m2d, (N, Hp, Wp)).reshape(1, Mp)       # interior indicator

    out = _run_both_generators(mask, xs, packed, Mp=Mp, Wp=Wp, CP=CP, F=F)  # (2, CP, Mp)

    def unpack(flat, cout):
        y = flat.reshape(CP, N, Hp, Wp)[:cout, :, 1:H + 1, 1:W + 1]
        return jnp.transpose(y, (1, 0, 2, 3))                      # (N, cout, H, W)

    fake_real = unpack(out[0], out_channels)
    fake_sketch = unpack(out[1], in_channels)
    return fake_real, fake_sketch


# Pure-JAX reference (same stand-in architecture) for correctness checking.
def _reference_forward(params, x_sketch, x_real):
    def conv(x, w, b, act):
        y = jax.lax.conv_general_dilated(
            x, w, (1, 1), "SAME", dimension_numbers=("NHWC", "HWIO", "NHWC"))
        y = y + b
        return jnp.maximum(y, 0.0) if act == "relu" else jnp.tanh(y)

    def gen(p, x_nchw):
        x = jnp.transpose(x_nchw, (0, 2, 3, 1)).astype(jnp.float32)
        x = conv(x, *p["c1"], "relu")
        x = conv(x, *p["c2"], "relu")
        x = conv(x, *p["c3"], "tanh")
        return jnp.transpose(x, (0, 3, 1, 2))

    return (gen(params["gen_SketchToReal"], x_sketch),
            gen(params["gen_RealToSketch"], x_real))


if __name__ == "__main__":
    key = jax.random.PRNGKey(0)
    kp, ks, kr = jax.random.split(key, 3)

    in_channels, out_channels, hidden = 3, 3, 8
    N, H, W = 2, 16, 16

    raw_params = init_cyclegan_params(kp, in_channels, out_channels, hidden)
    packed = pack_cyclegan_params(raw_params, in_channels, out_channels, hidden)

    x_sketch = jax.random.normal(ks, (N, in_channels, H, W), jnp.float32)
    x_real = jax.random.normal(kr, (N, out_channels, H, W), jnp.float32)

    fwd = jax.jit(functools.partial(cyclegan_forward,
                                    in_channels=in_channels,
                                    out_channels=out_channels))
    fake_real, fake_sketch = fwd(packed, x_sketch, x_real)
    jax.block_until_ready((fake_real, fake_sketch))

    assert fake_real.shape == (N, out_channels, H, W)
    assert fake_sketch.shape == (N, in_channels, H, W)

    # Check against the f32 pure-JAX reference (loose tol: bf16 MXU inputs/activations).
    ref_real, ref_sketch = _reference_forward(raw_params, x_sketch, x_real)
    assert jnp.allclose(fake_real, ref_real, atol=8e-2), "fake_Real mismatch"
    assert jnp.allclose(fake_sketch, ref_sketch, atol=8e-2), "fake_Sketch mismatch"

    print("KERNEL_OK")
</pallas_src>

<mosaic_0001>
module attributes {stable_mosaic.version = 11 : i64} {
  func.func @_generator_kernel(%arg0: i32, %arg1: memref<1x648xf32, #tpu.memory_space<vmem>>, %arg2: memref<1x8x904xbf16, #tpu.memory_space<vmem>>, %arg3: memref<1x8x72xbf16, #tpu.memory_space<vmem>>, %arg4: memref<1x8x72xbf16, #tpu.memory_space<vmem>>, %arg5: memref<1x8x72xbf16, #tpu.memory_space<vmem>>, %arg6: memref<1x8x1xf32, #tpu.memory_space<vmem>>, %arg7: memref<1x8x1xf32, #tpu.memory_space<vmem>>, %arg8: memref<1x8x1xf32, #tpu.memory_space<vmem>>, %arg9: memref<1x8x648xf32, #tpu.memory_space<vmem>>, %arg10: memref<8x904xbf16, #tpu.memory_space<vmem>>, %arg11: memref<72x648xbf16, #tpu.memory_space<vmem>>) attributes {dimension_semantics = [#tpu.dimension_semantics<parallel>], iteration_bounds = array<i64: 2>, scalar_prefetch = 0 : i64, scratch_operands = 2 : i64, tpu.core_type = #tpu.core_type<tc>, window_params = [{pipeline_mode = #tpu.pipeline_mode<synchronous>, transform_indices = @transform_0, window_bounds = array<i64: 1, 648>}, {transform_indices = @transform_1, window_bounds = array<i64: 1, 8, 904>}, {transform_indices = @transform_2, window_bounds = array<i64: 1, 8, 72>}, {transform_indices = @transform_3, window_bounds = array<i64: 1, 8, 72>}, {transform_indices = @transform_4, window_bounds = array<i64: 1, 8, 72>}, {transform_indices = @transform_5, window_bounds = array<i64: 1, 8, 1>}, {transform_indices = @transform_6, window_bounds = array<i64: 1, 8, 1>}, {transform_indices = @transform_7, window_bounds = array<i64: 1, 8, 1>}, {transform_indices = @transform_8, window_bounds = array<i64: 1, 8, 648>}]} {
    %c0 = arith.constant 0 : index
    %c0_0 = arith.constant 0 : index
    %0 = vector.load %arg1[%c0, %c0_0] : memref<1x648xf32, #tpu.memory_space<vmem>>, vector<1x648xf32>
    %cst = arith.constant 0.000000e+00 : bf16
    %1 = vector.broadcast %cst : bf16 to vector<8x128xbf16>
    %c0_1 = arith.constant 0 : index
    %c0_2 = arith.constant 0 : index
    %2 = vector.load %arg10[%c0_1, %c0_2] : memref<8x904xbf16, #tpu.memory_space<vmem>>, vector<8x128xbf16>
    tpu.vector_store %arg10[%c0_1, %c0_2], %1 {strides = array<i32>} : memref<8x904xbf16, #tpu.memory_space<vmem>>, vector<8x128xbf16>,
    %cst_3 = arith.constant 0.000000e+00 : bf16
    %3 = vector.broadcast %cst_3 : bf16 to vector<8x128xbf16>
    %c0_4 = arith.constant 0 : index
    %c776 = arith.constant 776 : index
    %4 = vector.load %arg10[%c0_4, %c776] : memref<8x904xbf16, #tpu.memory_space<vmem>>, vector<8x128xbf16>
    tpu.vector_store %arg10[%c0_4, %c776], %3 {strides = array<i32>} : memref<8x904xbf16, #tpu.memory_space<vmem>>, vector<8x128xbf16>,
    %c0_5 = arith.constant 0 : index
    %c0_6 = arith.constant 0 : index
    %c109 = arith.constant 109 : index
    %5 = vector.load %arg2[%c0_5, %c0_6, %c109] : memref<1x8x904xbf16, #tpu.memory_space<vmem>>, vector<1x8x648xbf16>
    %6 = vector.shape_cast %5 : vector<1x8x648xbf16> to vector<8x648xbf16>
    %c0_7 = arith.constant 0 : index
    %c0_8 = arith.constant 0 : index
    %7 = vector.load %arg11[%c0_7, %c0_8] : memref<72x648xbf16, #tpu.memory_space<vmem>>, vector<8x648xbf16>
    tpu.vector_store %arg11[%c0_7, %c0_8], %6 {strides = array<i32>} : memref<72x648xbf16, #tpu.memory_space<vmem>>, vector<8x648xbf16>,
    %c0_9 = arith.constant 0 : index
    %c0_10 = arith.constant 0 : index
    %c110 = arith.constant 110 : index
    %8 = vector.load %arg2[%c0_9, %c0_10, %c110] : memref<1x8x904xbf16, #tpu.memory_space<vmem>>, vector<1x8x648xbf16>
    %9 = vector.shape_cast %8 : vector<1x8x648xbf16> to vector<8x648xbf16>
    %c8 = arith.constant 8 : index
    %c0_11 = arith.constant 0 : index
    %10 = vector.load %arg11[%c8, %c0_11] : memref<72x648xbf16, #tpu.memory_space<vmem>>, vector<8x648xbf16>
    tpu.vector_store %arg11[%c8, %c0_11], %9 {strides = array<i32>} : memref<72x648xbf16, #tpu.memory_space<vmem>>, vector<8x648xbf16>,
    %c0_12 = arith.constant 0 : index
    %c0_13 = arith.constant 0 : index
    %c111 = arith.constant 111 : index
    %11 = vector.load %arg2[%c0_12, %c0_13, %c111] : memref<1x8x904xbf16, #tpu.memory_space<vmem>>, vector<1x8x648xbf16>
    %12 = vector.shape_cast %11 : vector<1x8x648xbf16> to vector<8x648xbf16>
    %c16 = arith.constant 16 : index
    %c0_14 = arith.constant 0 : index
    %13 = vector.load %arg11[%c16, %c0_14] : memref<72x648xbf16, #tpu.memory_space<vmem>>, vector<8x648xbf16>
    tpu.vector_store %arg11[%c16, %c0_14], %12 {strides = array<i32>} : memref<72x648xbf16, #tpu.memory_space<vmem>>, vector<8x648xbf16>,
    %c0_15 = arith.constant 0 : index
    %c0_16 = arith.constant 0 : index
    %c127 = arith.constant 127 : index
    %14 = vector.load %arg2[%c0_15, %c0_16, %c127] : memref<1x8x904xbf16, #tpu.memory_space<vmem>>, vector<1x8x648xbf16>
    %15 = vector.shape_cast %14 : vector<1x8x648xbf16> to vector<8x648xbf16>
    %c24 = arith.constant 24 : index
    %c0_17 = arith.constant 0 : index
    %16 = vector.load %arg11[%c24, %c0_17] : memref<72x648xbf16, #tpu.memory_space<vmem>>, vector<8x648xbf16>
    tpu.vector_store %arg11[%c24, %c0_17], %15 {strides = array<i32>} : memref<72x648xbf16, #tpu.memory_space<vmem>>, vector<8x648xbf16>,
    %c0_18 = arith.constant 0 : index
    %c0_19 = arith.constant 0 : index
    %c128 = arith.constant 128 : index
    %17 = vector.load %arg2[%c0_18, %c0_19, %c128] : memref<1x8x904xbf16, #tpu.memory_space<vmem>>, vector<1x8x648xbf16>
    %18 = vector.shape_cast %17 : vector<1x8x648xbf16> to vector<8x648xbf16>
    %c32 = arith.constant 32 : index
    %c0_20 = arith.constant 0 : index
    %19 = vector.load %arg11[%c32, %c0_20] : memref<72x648xbf16, #tpu.memory_space<vmem>>, vector<8x648xbf16>
    tpu.vector_store %arg11[%c32, %c0_20], %18 {strides = array<i32>} : memref<72x648xbf16, #tpu.memory_space<vmem>>, vector<8x648xbf16>,
    %c0_21 = arith.constant 0 : index
    %c0_22 = arith.constant 0 : index
    %c129 = arith.constant 129 : index
    %20 = vector.load %arg2[%c0_21, %c0_22, %c129] : memref<1x8x904xbf16, #tpu.memory_space<vmem>>, vector<1x8x648xbf16>
    %21 = vector.shape_cast %20 : vector<1x8x648xbf16> to vector<8x648xbf16>
    %c40 = arith.constant 40 : index
    %c0_23 = arith.constant 0 : index
    %22 = vector.load %arg11[%c40, %c0_23] : memref<72x648xbf16, #tpu.memory_space<vmem>>, vector<8x648xbf16>
    tpu.vector_store %arg11[%c40, %c0_23], %21 {strides = array<i32>} : memref<72x648xbf16, #tpu.memory_space<vmem>>, vector<8x648xbf16>,
    %c0_24 = arith.constant 0 : index
    %c0_25 = arith.constant 0 : index
    %c145 = arith.constant 145 : index
    %23 = vector.load %arg2[%c0_24, %c0_25, %c145] : memref<1x8x904xbf16, #tpu.memory_space<vmem>>, vector<1x8x648xbf16>
    %24 = vector.shape_cast %23 : vector<1x8x648xbf16> to vector<8x648xbf16>
    %c48 = arith.constant 48 : index
    %c0_26 = arith.constant 0 : index
    %25 = vector.load %arg11[%c48, %c0_26] : memref<72x648xbf16, #tpu.memory_space<vmem>>, vector<8x648xbf16>
    tpu.vector_store %arg11[%c48, %c0_26], %24 {strides = array<i32>} : memref<72x648xbf16, #tpu.memory_space<vmem>>, vector<8x648xbf16>,
    %c0_27 = arith.constant 0 : index
    %c0_28 = arith.constant 0 : index
    %c146 = arith.constant 146 : index
    %26 = vector.load %arg2[%c0_27, %c0_28, %c146] : memref<1x8x904xbf16, #tpu.memory_space<vmem>>, vector<1x8x648xbf16>
    %27 = vector.shape_cast %26 : vector<1x8x648xbf16> to vector<8x648xbf16>
    %c56 = arith.constant 56 : index
    %c0_29 = arith.constant 0 : index
    %28 = vector.load %arg11[%c56, %c0_29] : memref<72x648xbf16, #tpu.memory_space<vmem>>, vector<8x648xbf16>
    tpu.vector_store %arg11[%c56, %c0_29], %27 {strides = array<i32>} : memref<72x648xbf16, #tpu.memory_space<vmem>>, vector<8x648xbf16>,
    %c0_30 = arith.constant 0 : index
    %c0_31 = arith.constant 0 : index
    %c147 = arith.constant 147 : index
    %29 = vector.load %arg2[%c0_30, %c0_31, %c147] : memref<1x8x904xbf16, #tpu.memory_space<vmem>>, vector<1x8x648xbf16>
    %30 = vector.shape_cast %29 : vector<1x8x648xbf16> to vector<8x648xbf16>
    %c64 = arith.constant 64 : index
    %c0_32 = arith.constant 0 : index
    %31 = vector.load %arg11[%c64, %c0_32] : memref<72x648xbf16, #tpu.memory_space<vmem>>, vector<8x648xbf16>
    tpu.vector_store %arg11[%c64, %c0_32], %30 {strides = array<i32>} : memref<72x648xbf16, #tpu.memory_space<vmem>>, vector<8x648xbf16>,
    %c0_33 = arith.constant 0 : index
    %c0_34 = arith.constant 0 : index
    %c0_35 = arith.constant 0 : index
    %32 = vector.load %arg3[%c0_33, %c0_34, %c0_35] : memref<1x8x72xbf16, #tpu.memory_space<vmem>>, vector<1x8x72xbf16>
    %33 = vector.shape_cast %32 : vector<1x8x72xbf16> to vector<8x72xbf16>
    %c0_36 = arith.constant 0 : index
    %c0_37 = arith.constant 0 : index
    %34 = vector.load %arg11[%c0_36, %c0_37] : memref<72x648xbf16, #tpu.memory_space<vmem>>, vector<72x648xbf16>
    %cst_38 = arith.constant dense<0.000000e+00> : vector<8x648xf32>
    %35 = tpu.matmul %33, %34, %cst_38 {dimension_numbers = #tpu.dot_dimension_numbers<[1], [0], [0], [1], [0, 0, 1, 1], [], []>} : vector<8x72xbf16>, vector<72x648xbf16>, vector<8x648xf32> -> vector<8x648xf32>
    %c0_39 = arith.constant 0 : index
    %c0_40 = arith.constant 0 : index
    %c0_41 = arith.constant 0 : index
    %36 = vector.load %arg6[%c0_39, %c0_40, %c0_41] : memref<1x8x1xf32, #tpu.memory_space<vmem>>, vector<1x8x1xf32>
    %37 = vector.shape_cast %36 : vector<1x8x1xf32> to vector<8x1xf32>
    %38 = vector.broadcast %37 : vector<8x1xf32> to vector<8x648xf32>
    %39 = arith.addf %35, %38 : vector<8x648xf32>
    %cst_42 = arith.constant 0.000000e+00 : f32
    %40 = vector.broadcast %cst_42 : f32 to vector<8x648xf32>
    %41 = arith.maximumf %39, %40 : vector<8x648xf32>
    %42 = vector.broadcast %0 : vector<1x648xf32> to vector<8x648xf32>
    %43 = arith.mulf %41, %42 : vector<8x648xf32>
    %44 = arith.truncf %43 : vector<8x648xf32> to vector<8x648xbf16>
    %c0_43 = arith.constant 0 : index
    %c128_44 = arith.constant 128 : index
    %45 = vector.load %arg10[%c0_43, %c128_44] : memref<8x904xbf16, #tpu.memory_space<vmem>>, vector<8x648xbf16>
    tpu.vector_store %arg10[%c0_43, %c128_44], %44 {strides = array<i32>} : memref<8x904xbf16, #tpu.memory_space<vmem>>, vector<8x648xbf16>,
    %c0_45 = arith.constant 0 : index
    %c109_46 = arith.constant 109 : index
    %46 = vector.load %arg10[%c0_45, %c109_46] : memref<8x904xbf16, #tpu.memory_space<vmem>>, vector<8x648xbf16>
    %c0_47 = arith.constant 0 : index
    %c0_48 = arith.constant 0 : index
    %47 = vector.load %arg11[%c0_47, %c0_48] : memref<72x648xbf16, #tpu.memory_space<vmem>>, vector<8x648xbf16>
    tpu.vector_store %arg11[%c0_47, %c0_48], %46 {strides = array<i32>} : memref<72x648xbf16, #tpu.memory_space<vmem>>, vector<8x648xbf16>,
    %c0_49 = arith.constant 0 : index
    %c110_50 = arith.constant 110 : index
    %48 = vector.load %arg10[%c0_49, %c110_50] : memref<8x904xbf16, #tpu.memory_space<vmem>>, vector<8x648xbf16>
    %c8_51 = arith.constant 8 : index
    %c0_52 = arith.constant 0 : index
    %49 = vector.load %arg11[%c8_51, %c0_52] : memref<72x648xbf16, #tpu.memory_space<vmem>>, vector<8x648xbf16>
    tpu.vector_store %arg11[%c8_51, %c0_52], %48 {strides = array<i32>} : memref<72x648xbf16, #tpu.memory_space<vmem>>, vector<8x648xbf16>,
    %c0_53 = arith.constant 0 : index
    %c111_54 = arith.constant 111 : index
    %50 = vector.load %arg10[%c0_53, %c111_54] : memref<8x904xbf16, #tpu.memory_space<vmem>>, vector<8x648xbf16>
    %c16_55 = arith.constant 16 : index
    %c0_56 = arith.constant 0 : index
    %51 = vector.load %arg11[%c16_55, %c0_56] : memref<72x648xbf16, #tpu.memory_space<vmem>>, vector<8x648xbf16>
    tpu.vector_store %arg11[%c16_55, %c0_56], %50 {strides = array<i32>} : memref<72x648xbf16, #tpu.memory_space<vmem>>, vector<8x648xbf16>,
    %c0_57 = arith.constant 0 : index
    %c127_58 = arith.constant 127 : index
    %52 = vector.load %arg10[%c0_57, %c127_58] : memref<8x904xbf16, #tpu.memory_space<vmem>>, vector<8x648xbf16>
    %c24_59 = arith.constant 24 : index
    %c0_60 = arith.constant 0 : index
    %53 = vector.load %arg11[%c24_59, %c0_60] : memref<72x648xbf16, #tpu.memory_space<vmem>>, vector<8x648xbf16>
    tpu.vector_store %arg11[%c24_59, %c0_60], %52 {strides = array<i32>} : memref<72x648xbf16, #tpu.memory_space<vmem>>, vector<8x648xbf16>,
    %c0_61 = arith.constant 0 : index
    %c128_62 = arith.constant 128 : index
    %54 = vector.load %arg10[%c0_61, %c128_62] : memref<8x904xbf16, #tpu.memory_space<vmem>>, vector<8x648xbf16>
    %c32_63 = arith.constant 32 : index
    %c0_64 = arith.constant 0 : index
    %55 = vector.load %arg11[%c32_63, %c0_64] : memref<72x648xbf16, #tpu.memory_space<vmem>>, vector<8x648xbf16>
    tpu.vector_store %arg11[%c32_63, %c0_64], %54 {strides = array<i32>} : memref<72x648xbf16, #tpu.memory_space<vmem>>, vector<8x648xbf16>,
    %c0_65 = arith.constant 0 : index
    %c129_66 = arith.constant 129 : index
    %56 = vector.load %arg10[%c0_65, %c129_66] : memref<8x904xbf16, #tpu.memory_space<vmem>>, vector<8x648xbf16>
    %c40_67 = arith.constant 40 : index
    %c0_68 = arith.constant 0 : index
    %57 = vector.load %arg11[%c40_67, %c0_68] : memref<72x648xbf16, #tpu.memory_space<vmem>>, vector<8x648xbf16>
    tpu.vector_store %arg11[%c40_67, %c0_68], %56 {strides = array<i32>} : memref<72x648xbf16, #tpu.memory_space<vmem>>, vector<8x648xbf16>,
    %c0_69 = arith.constant 0 : index
    %c145_70 = arith.constant 145 : index
    %58 = vector.load %arg10[%c0_69, %c145_70] : memref<8x904xbf16, #tpu.memory_space<vmem>>, vector<8x648xbf16>
    %c48_71 = arith.constant 48 : index
    %c0_72 = arith.constant 0 : index
    %59 = vector.load %arg11[%c48_71, %c0_72] : memref<72x648xbf16, #tpu.memory_space<vmem>>, vector<8x648xbf16>
    tpu.vector_store %arg11[%c48_71, %c0_72], %58 {strides = array<i32>} : memref<72x648xbf16, #tpu.memory_space<vmem>>, vector<8x648xbf16>,
    %c0_73 = arith.constant 0 : index
    %c146_74 = arith.constant 146 : index
    %60 = vector.load %arg10[%c0_73, %c146_74] : memref<8x904xbf16, #tpu.memory_space<vmem>>, vector<8x648xbf16>
    %c56_75 = arith.constant 56 : index
    %c0_76 = arith.constant 0 : index
    %61 = vector.load %arg11[%c56_75, %c0_76] : memref<72x648xbf16, #tpu.memory_space<vmem>>, vector<8x648xbf16>
    tpu.vector_store %arg11[%c56_75, %c0_76], %60 {strides = array<i32>} : memref<72x648xbf16, #tpu.memory_space<vmem>>, vector<8x648xbf16>,
    %c0_77 = arith.constant 0 : index
    %c147_78 = arith.constant 147 : index
    %62 = vector.load %arg10[%c0_77, %c147_78] : memref<8x904xbf16, #tpu.memory_space<vmem>>, vector<8x648xbf16>
    %c64_79 = arith.constant 64 : index
    %c0_80 = arith.constant 0 : index
    %63 = vector.load %arg11[%c64_79, %c0_80] : memref<72x648xbf16, #tpu.memory_space<vmem>>, vector<8x648xbf16>
    tpu.vector_store %arg11[%c64_79, %c0_80], %62 {strides = array<i32>} : memref<72x648xbf16, #tpu.memory_space<vmem>>, vector<8x648xbf16>,
    %c0_81 = arith.constant 0 : index
    %c0_82 = arith.constant 0 : index
    %c0_83 = arith.constant 0 : index
    %64 = vector.load %arg4[%c0_81, %c0_82, %c0_83] : memref<1x8x72xbf16, #tpu.memory_space<vmem>>, vector<1x8x72xbf16>
    %65 = vector.shape_cast %64 : vector<1x8x72xbf16> to vector<8x72xbf16>
    %c0_84 = arith.constant 0 : index
    %c0_85 = arith.constant 0 : index
    %66 = vector.load %arg11[%c0_84, %c0_85] : memref<72x648xbf16, #tpu.memory_space<vmem>>, vector<72x648xbf16>
    %cst_86 = arith.constant dense<0.000000e+00> : vector<8x648xf32>
    %67 = tpu.matmul %65, %66, %cst_86 {dimension_numbers = #tpu.dot_dimension_numbers<[1], [0], [0], [1], [0, 0, 1, 1], [], []>} : vector<8x72xbf16>, vector<72x648xbf16>, vector<8x648xf32> -> vector<8x648xf32>
    %c0_87 = arith.constant 0 : index
    %c0_88 = arith.constant 0 : index
    %c0_89 = arith.constant 0 : index
    %68 = vector.load %arg7[%c0_87, %c0_88, %c0_89] : memref<1x8x1xf32, #tpu.memory_space<vmem>>, vector<1x8x1xf32>
    %69 = vector.shape_cast %68 : vector<1x8x1xf32> to vector<8x1xf32>
    %70 = vector.broadcast %69 : vector<8x1xf32> to vector<8x648xf32>
    %71 = arith.addf %67, %70 : vector<8x648xf32>
    %cst_90 = arith.constant 0.000000e+00 : f32
    %72 = vector.broadcast %cst_90 : f32 to vector<8x648xf32>
    %73 = arith.maximumf %71, %72 : vector<8x648xf32>
    %74 = vector.broadcast %0 : vector<1x648xf32> to vector<8x648xf32>
    %75 = arith.mulf %73, %74 : vector<8x648xf32>
    %76 = arith.truncf %75 : vector<8x648xf32> to vector<8x648xbf16>
    %c0_91 = arith.constant 0 : index
    %c128_92 = arith.constant 128 : index
    %77 = vector.load %arg10[%c0_91, %c128_92] : memref<8x904xbf16, #tpu.memory_space<vmem>>, vector<8x648xbf16>
    tpu.vector_store %arg10[%c0_91, %c128_92], %76 {strides = array<i32>} : memref<8x904xbf16, #tpu.memory_space<vmem>>, vector<8x648xbf16>,
    %c0_93 = arith.constant 0 : index
    %c109_94 = arith.constant 109 : index
    %78 = vector.load %arg10[%c0_93, %c109_94] : memref<8x904xbf16, #tpu.memory_space<vmem>>, vector<8x648xbf16>
    %c0_95 = arith.constant 0 : index
    %c0_96 = arith.constant 0 : index
    %79 = vector.load %arg11[%c0_95, %c0_96] : memref<72x648xbf16, #tpu.memory_space<vmem>>, vector<8x648xbf16>
    tpu.vector_store %arg11[%c0_95, %c0_96], %78 {strides = array<i32>} : memref<72x648xbf16, #tpu.memory_space<vmem>>, vector<8x648xbf16>,
    %c0_97 = arith.constant 0 : index
    %c110_98 = arith.constant 110 : index
    %80 = vector.load %arg10[%c0_97, %c110_98] : memref<8x904xbf16, #tpu.memory_space<vmem>>, vector<8x648xbf16>
    %c8_99 = arith.constant 8 : index
    %c0_100 = arith.constant 0 : index
    %81 = vector.load %arg11[%c8_99, %c0_100] : memref<72x648xbf16, #tpu.memory_space<vmem>>, vector<8x648xbf16>
    tpu.vector_store %arg11[%c8_99, %c0_100], %80 {strides = array<i32>} : memref<72x648xbf16, #tpu.memory_space<vmem>>, vector<8x648xbf16>,
    %c0_101 = arith.constant 0 : index
    %c111_102 = arith.constant 111 : index
    %82 = vector.load %arg10[%c0_101, %c111_102] : memref<8x904xbf16, #tpu.memory_space<vmem>>, vector<8x648xbf16>
    %c16_103 = arith.constant 16 : index
    %c0_104 = arith.constant 0 : index
    %83 = vector.load %arg11[%c16_103, %c0_104] : memref<72x648xbf16, #tpu.memory_space<vmem>>, vector<8x648xbf16>
    tpu.vector_store %arg11[%c16_103, %c0_104], %82 {strides = array<i32>} : memref<72x648xbf16, #tpu.memory_space<vmem>>, vector<8x648xbf16>,
    %c0_105 = arith.constant 0 : index
    %c127_106 = arith.constant 127 : index
    %84 = vector.load %arg10[%c0_105, %c127_106] : memref<8x904xbf16, #tpu.memory_space<vmem>>, vector<8x648xbf16>
    %c24_107 = arith.constant 24 : index
    %c0_108 = arith.constant 0 : index
    %85 = vector.load %arg11[%c24_107, %c0_108] : memref<72x648xbf16, #tpu.memory_space<vmem>>, vector<8x648xbf16>
    tpu.vector_store %arg11[%c24_107, %c0_108], %84 {strides = array<i32>} : memref<72x648xbf16, #tpu.memory_space<vmem>>, vector<8x648xbf16>,
    %c0_109 = arith.constant 0 : index
    %c128_110 = arith.constant 128 : index
    %86 = vector.load %arg10[%c0_109, %c128_110] : memref<8x904xbf16, #tpu.memory_space<vmem>>, vector<8x648xbf16>
    %c32_111 = arith.constant 32 : index
    %c0_112 = arith.constant 0 : index
    %87 = vector.load %arg11[%c32_111, %c0_112] : memref<72x648xbf16, #tpu.memory_space<vmem>>, vector<8x648xbf16>
    tpu.vector_store %arg11[%c32_111, %c0_112], %86 {strides = array<i32>} : memref<72x648xbf16, #tpu.memory_space<vmem>>, vector<8x648xbf16>,
    %c0_113 = arith.constant 0 : index
    %c129_114 = arith.constant 129 : index
    %88 = vector.load %arg10[%c0_113, %c129_114] : memref<8x904xbf16, #tpu.memory_space<vmem>>, vector<8x648xbf16>
    %c40_115 = arith.constant 40 : index
    %c0_116 = arith.constant 0 : index
    %89 = vector.load %arg11[%c40_115, %c0_116] : memref<72x648xbf16, #tpu.memory_space<vmem>>, vector<8x648xbf16>
    tpu.vector_store %arg11[%c40_115, %c0_116], %88 {strides = array<i32>} : memref<72x648xbf16, #tpu.memory_space<vmem>>, vector<8x648xbf16>,
    %c0_117 = arith.constant 0 : index
    %c145_118 = arith.constant 145 : index
    %90 = vector.load %arg10[%c0_117, %c145_118] : memref<8x904xbf16, #tpu.memory_space<vmem>>, vector<8x648xbf16>
    %c48_119 = arith.constant 48 : index
    %c0_120 = arith.constant 0 : index
    %91 = vector.load %arg11[%c48_119, %c0_120] : memref<72x648xbf16, #tpu.memory_space<vmem>>, vector<8x648xbf16>
    tpu.vector_store %arg11[%c48_119, %c0_120], %90 {strides = array<i32>} : memref<72x648xbf16, #tpu.memory_space<vmem>>, vector<8x648xbf16>,
    %c0_121 = arith.constant 0 : index
    %c146_122 = arith.constant 146 : index
    %92 = vector.load %arg10[%c0_121, %c146_122] : memref<8x904xbf16, #tpu.memory_space<vmem>>, vector<8x648xbf16>
    %c56_123 = arith.constant 56 : index
    %c0_124 = arith.constant 0 : index
    %93 = vector.load %arg11[%c56_123, %c0_124] : memref<72x648xbf16, #tpu.memory_space<vmem>>, vector<8x648xbf16>
    tpu.vector_store %arg11[%c56_123, %c0_124], %92 {strides = array<i32>} : memref<72x648xbf16, #tpu.memory_space<vmem>>, vector<8x648xbf16>,
    %c0_125 = arith.constant 0 : index
    %c147_126 = arith.constant 147 : index
    %94 = vector.load %arg10[%c0_125, %c147_126] : memref<8x904xbf16, #tpu.memory_space<vmem>>, vector<8x648xbf16>
    %c64_127 = arith.constant 64 : index
    %c0_128 = arith.constant 0 : index
    %95 = vector.load %arg11[%c64_127, %c0_128] : memref<72x648xbf16, #tpu.memory_space<vmem>>, vector<8x648xbf16>
    tpu.vector_store %arg11[%c64_127, %c0_128], %94 {strides = array<i32>} : memref<72x648xbf16, #tpu.memory_space<vmem>>, vector<8x648xbf16>,
    %c0_129 = arith.constant 0 : index
    %c0_130 = arith.constant 0 : index
    %c0_131 = arith.constant 0 : index
    %96 = vector.load %arg5[%c0_129, %c0_130, %c0_131] : memref<1x8x72xbf16, #tpu.memory_space<vmem>>, vector<1x8x72xbf16>
    %97 = vector.shape_cast %96 : vector<1x8x72xbf16> to vector<8x72xbf16>
    %c0_132 = arith.constant 0 : index
    %c0_133 = arith.constant 0 : index
    %98 = vector.load %arg11[%c0_132, %c0_133] : memref<72x648xbf16, #tpu.memory_space<vmem>>, vector<72x648xbf16>
    %cst_134 = arith.constant dense<0.000000e+00> : vector<8x648xf32>
    %99 = tpu.matmul %97, %98, %cst_134 {dimension_numbers = #tpu.dot_dimension_numbers<[1], [0], [0], [1], [0, 0, 1, 1], [], []>} : vector<8x72xbf16>, vector<72x648xbf16>, vector<8x648xf32> -> vector<8x648xf32>
    %c0_135 = arith.constant 0 : index
    %c0_136 = arith.constant 0 : index
    %c0_137 = arith.constant 0 : index
    %100 = vector.load %arg8[%c0_135, %c0_136, %c0_137] : memref<1x8x1xf32, #tpu.memory_space<vmem>>, vector<1x8x1xf32>
    %101 = vector.shape_cast %100 : vector<1x8x1xf32> to vector<8x1xf32>
    %102 = vector.broadcast %101 : vector<8x1xf32> to vector<8x648xf32>
    %103 = arith.addf %99, %102 : vector<8x648xf32>
    %104 = math.tanh %103 : vector<8x648xf32>
    %c0_138 = arith.constant 0 : index
    %c0_139 = arith.constant 0 : index
    %c0_140 = arith.constant 0 : index
    %105 = vector.load %arg9[%c0_138, %c0_139, %c0_140] : memref<1x8x648xf32, #tpu.memory_space<vmem>>, vector<1x8x648xf32>
    %106 = vector.shape_cast %105 : vector<1x8x648xf32> to vector<8x648xf32>
    %107 = vector.shape_cast %104 : vector<8x648xf32> to vector<1x8x648xf32>
    tpu.vector_store %arg9[%c0_138, %c0_139, %c0_140], %107 {strides = array<i32>} : memref<1x8x648xf32, #tpu.memory_space<vmem>>, vector<1x8x648xf32>,
    return
  }
  func.func @transform_0(%arg0: i32) -> (i32, i32) {
    %c0_i32 = arith.constant 0 : i32
    %c0_i32_0 = arith.constant 0 : i32
    %c0_i32_1 = arith.constant 0 : i32
    return %c0_i32, %c0_i32_0 : i32, i32
  }
  func.func @transform_1(%arg0: i32) -> (i32, i32, i32) {
    %c0_i32 = arith.constant 0 : i32
    %c0_i32_0 = arith.constant 0 : i32
    %c0_i32_1 = arith.constant 0 : i32
    return %arg0, %c0_i32, %c0_i32_0 : i32, i32, i32
  }
  func.func @transform_2(%arg0: i32) -> (i32, i32, i32) {
    %c0_i32 = arith.constant 0 : i32
    %c0_i32_0 = arith.constant 0 : i32
    %c0_i32_1 = arith.constant 0 : i32
    return %arg0, %c0_i32, %c0_i32_0 : i32, i32, i32
  }
  func.func @transform_3(%arg0: i32) -> (i32, i32, i32) {
    %c0_i32 = arith.constant 0 : i32
    %c0_i32_0 = arith.constant 0 : i32
    %c0_i32_1 = arith.constant 0 : i32
    return %arg0, %c0_i32, %c0_i32_0 : i32, i32, i32
  }
  func.func @transform_4(%arg0: i32) -> (i32, i32, i32) {
    %c0_i32 = arith.constant 0 : i32
    %c0_i32_0 = arith.constant 0 : i32
    %c0_i32_1 = arith.constant 0 : i32
    return %arg0, %c0_i32, %c0_i32_0 : i32, i32, i32
  }
  func.func @transform_5(%arg0: i32) -> (i32, i32, i32) {
    %c0_i32 = arith.constant 0 : i32
    %c0_i32_0 = arith.constant 0 : i32
    %c0_i32_1 = arith.constant 0 : i32
    return %arg0, %c0_i32, %c0_i32_0 : i32, i32, i32
  }
  func.func @transform_6(%arg0: i32) -> (i32, i32, i32) {
    %c0_i32 = arith.constant 0 : i32
    %c0_i32_0 = arith.constant 0 : i32
    %c0_i32_1 = arith.constant 0 : i32
    return %arg0, %c0_i32, %c0_i32_0 : i32, i32, i32
  }
  func.func @transform_7(%arg0: i32) -> (i32, i32, i32) {
    %c0_i32 = arith.constant 0 : i32
    %c0_i32_0 = arith.constant 0 : i32
    %c0_i32_1 = arith.constant 0 : i32
    return %arg0, %c0_i32, %c0_i32_0 : i32, i32, i32
  }
  func.func @transform_8(%arg0: i32) -> (i32, i32, i32) {
    %c0_i32 = arith.constant 0 : i32
    %c0_i32_0 = arith.constant 0 : i32
    %c0_i32_1 = arith.constant 0 : i32
    return %arg0, %c0_i32, %c0_i32_0 : i32, i32, i32
  }
}

</mosaic_0001>

<bundles_post_ra>
// kernel: squeeze.3
= control target key start
LH: loop header
LB: loop body
LE: loop exit
PB: predicated region body
PF: predicated region fallthrough
CT: control target
= control target key end

     0   :  { %s749_s10 = smov 118   ;;  %s750_s11 = smov 114   ;;  %vm3_vm0 = vcmask 146432   ;;  %vm396_vm1 = vcmask 965632   ;;  %vm422_vm2 = vcmask 982016   ;;  %vm448_vm3 = vcmask 998400   ;;  %s1480_s0 = inlined_call_operand.vmem [shape: f32[1,8,648], index: 0, kind: input, shape index: {}]   ;;  %s1481_s1 = inlined_call_operand.vmem [shape: f32[8,2,18,18], index: 1, kind: output, shape index: {}]  }
   0x1   :  { %v797_v0 = vld [vmem:[%s1480_s0 + $0x20] sm:$0xff]   ;;  %v531_v1 = vld [vmem:[%s1480_s0 + $0x10] sm:$0xff]   ;;  %v526_v3 = vld.sshfl [vmem:[%s1480_s0 + $0x18] sm:$0xff pattern:$0x67452301]   ;;  %s751_s26 = smov 116  }
   0x2   :  { %10 = vrot.lane.b32.xlu0 %v797_v0, %s749_s10  ;;  %36 = vrot.lane.b32.xlu1 %v531_v1, %s750_s11  ;;  %v806_v2 = vld [vmem:[%s1480_s0] sm:$0xff]   ;;  %v814_v4 = vld [vmem:[%s1480_s0 + $0x8] sm:$0xff]   ;;  %s752_s27 = smov 112   ;;  %s753_s3 = smov 110   ;;  %vm474_vm4 = vcmask 1014784   ;;  %vm499_vm5 = vcmask 1031168  }
   0x3   :  { %4 = vst.msk [vmem:[%s1481_s1] ss:$48 sm:$0x3] %vm3_vm0, %v806_v2   ;;  %5 = vst.msk [vmem:[%s1481_s1] ss:$48 sm:$0xc] %vm3_vm0, %v806_v2   ;;  %v475_v11 = vsel %vm474_vm4, %v531_v1, %v814_v4  ;;  %v500_v12 = vsel %vm499_vm5, %v814_v4, %v806_v2 }
   0x4   :  { %6 = vst.msk [vmem:[%s1481_s1] ss:$48 sm:$0x30] %vm3_vm0, %v806_v2   ;;  %7 = vst.msk [vmem:[%s1481_s1] ss:$48 sm:$0xc0] %vm3_vm0, %v806_v2  }
   0x5   :  { %v666_v5 = vld [vmem:[%s1480_s0 + $0x28] sm:$0xff]   ;;  %v843_v6 = vld [vmem:[%s1480_s0 + $0x18] sm:$0xff]   ;;  %s754_s4 = smov 100   ;;  %v685_v9 = vld.sshfl [vmem:[%s1480_s0 + $0x10] sm:$0xff pattern:$0x67452301]  }
   0x6   :  { %23 = vrot.lane.b32.xlu0 %v526_v3, %s751_s26  ;;  %49 = vrot.lane.b32.xlu1 %v814_v4, %s752_s27  ;;  %v397_v7 = vsel %vm396_vm1, %v666_v5, %v797_v0  ;;  %v423_v8 = vsel %vm422_vm2, %v797_v0, %v843_v6  ;;  %s755_s0 = smov 10   ;;  %s756_s7 = smov 8   ;;  %v449_v10 = vsel %vm448_vm3, %v526_v3, %v685_v9  ;;  %vm400_vm6 = vcmask 80896  }
   0x7   :  { %s757_s8 = smov 6   ;;  %s758_s9 = smov 4   ;;  %vm426_vm7 = vcmask 64512   ;;  %vm409_vm8 = vcmask 146512   ;;  %vm435_vm9 = vcmask 146496   ;;  %vm452_vm10 = vcmask 48128  }
   0x8   :  { %s759_s10 = smov 2   ;;  %s760_s11 = smov 98   ;;  %vm478_vm11 = vcmask 31744   ;;  %vm461_vm12 = vcmask 146480   ;;  %vm487_vm13 = vcmask 146464   ;;  %vm503_vm14 = vcmask 15360  }
   0x9   :  { %s761_s12 = smov 96   ;;  %s762_s13 = smov 94   ;;  %vm512_vm15 = vcmask 146448  }
   0xa   :  { %61 = vrot.lane.b32.xlu0 %v806_v2, %s753_s3  ;;  %74 = vrot.lane.b32.xlu1 %v797_v0, %s754_s4  ;;  %s763_s14 = smov 92   ;;  %s764_s15 = smov 82  }
   0xb   :  { %s765_s16 = smov 80   ;;  %s766_s17 = smov 78  }
   0xc   :  { %s767_s18 = smov 76   ;;  %s768_s19 = smov 74  }
   0xd   :  { %s769_s20 = smov 64   ;;  %s770_s21 = smov 62  }
   0xe   :  { %398 = vrot.lane.b32.xlu0 %v397_v7, %s755_s0  ;;  %424 = vrot.lane.b32.xlu1 %v423_v8, %s756_s7  ;;  %s771_s22 = smov 60   ;;  %s772_s23 = smov 58  }
   0xf   :  { %s773_s24 = smov 56   ;;  %s774_s25 = smov 46  }
  0x10   :  { %s775_s26 = smov 44   ;;  %s776_s27 = smov 42  }
  0x11   :  { %s777_s28 = smov 40   ;;  %s778_s29 = smov 38  }
  0x12   :  { %450 = vrot.lane.b32.xlu0 %v449_v10, %s757_s8  ;;  %476 = vrot.lane.b32.xlu1 %v475_v11, %s758_s9  ;;  %s779_s30 = smov 28   ;;  %s780_s2 = smov 26  }
  0x13   :  { %s781_s3 = smov 24   ;;  %s782_s4 = smov 22  }
  0x14   :  { %s783_s5 = smov 20  }
  0x16   :  { %501 = vrot.lane.b32.xlu0 %v500_v12, %s759_s10  ;;  %87 = vrot.lane.b32.xlu1 %v526_v3, %s760_s11 }
  0x1a   :  { %100 = vrot.lane.b32.xlu0 %v685_v9, %s761_s12  ;;  %113 = vrot.lane.b32.xlu1 %v814_v4, %s762_s13 }
  0x1e   :  { %125 = vrot.lane.b32.xlu0 %v806_v2, %s763_s14  ;;  %138 = vrot.lane.b32.xlu1 %v797_v0, %s764_s15 }
  0x22   :  { %151 = vrot.lane.b32.xlu0 %v526_v3, %s765_s16  ;;  %164 = vrot.lane.b32.xlu1 %v685_v9, %s766_s17 }
  0x26   :  { %177 = vrot.lane.b32.xlu0 %v814_v4, %s767_s18  ;;  %189 = vrot.lane.b32.xlu1 %v806_v2, %s768_s19 }
  0x2a   :  { %202 = vrot.lane.b32.xlu0 %v797_v0, %s769_s20  ;;  %215 = vrot.lane.b32.xlu1 %v526_v3, %s770_s21 }
  0x2e   :  { %228 = vrot.lane.b32.xlu0 %v685_v9, %s771_s22  ;;  %241 = vrot.lane.b32.xlu1 %v814_v4, %s772_s23 }
  0x32   :  { %253 = vrot.lane.b32.xlu0 %v806_v2, %s773_s24  ;;  %266 = vrot.lane.b32.xlu1 %v797_v0, %s774_s25 }
  0x36   :  { %279 = vrot.lane.b32.xlu0 %v843_v6, %s775_s26  ;;  %292 = vrot.lane.b32.xlu1 %v685_v9, %s776_s27 }
  0x3a   :  { %305 = vrot.lane.b32.xlu0 %v814_v4, %s777_s28  ;;  %317 = vrot.lane.b32.xlu1 %v806_v2, %s778_s29 }
  0x3e   :  { %330 = vrot.lane.b32.xlu0 %v797_v0, %s779_s30  ;;  %343 = vrot.lane.b32.xlu1 %v843_v6, %s780_s2 }
  0x42   :  { %356 = vrot.lane.b32.xlu0 %v685_v9, %s781_s3  ;;  %369 = vrot.lane.b32.xlu1 %v814_v4, %s782_s4 }
  0x46   :  { %381 = vrot.lane.b32.xlu0 %v806_v2, %s783_s5 }
  0x74   :  { %v11_v13 = vpop.permute.xlu0 %10   ;;  %v37_v14 = vpop.permute.xlu1 %36  }
  0x75   :  { %522 = vst.msk [vmem:[%s1481_s1 + $0x23] ss:$48 sm:$0x3] %vm3_vm0, %v11_v13   ;;  %523 = vst.msk [vmem:[%s1481_s1 + $0x23] ss:$48 sm:$0xc] %vm3_vm0, %v11_v13  }
  0x76   :  { %524 = vst.msk [vmem:[%s1481_s1 + $0x23] ss:$48 sm:$0x30] %vm3_vm0, %v11_v13   ;;  %525 = vst.msk [vmem:[%s1481_s1 + $0x23] ss:$48 sm:$0xc0] %vm3_vm0, %v11_v13  }
  0x77   :  { %532 = vst.msk [vmem:[%s1481_s1 + $0xf] ss:$48 sm:$0x3] %vm3_vm0, %v37_v14   ;;  %533 = vst.msk [vmem:[%s1481_s1 + $0xf] ss:$48 sm:$0xc] %vm3_vm0, %v37_v14  }
  0x78   :  { %534 = vst.msk [vmem:[%s1481_s1 + $0xf] ss:$48 sm:$0x30] %vm3_vm0, %v37_v14   ;;  %535 = vst.msk [vmem:[%s1481_s1 + $0xf] ss:$48 sm:$0xc0] %vm3_vm0, %v37_v14   ;;  %v24_v15 = vpop.permute.xlu0 %23   ;;  %v50_v16 = vpop.permute.xlu1 %49  }
  0x79   :  { %527 = vst.msk [vmem:[%s1481_s1 + $0x4c] ss:$-48 sm:$0x3] %vm3_vm0, %v24_v15   ;;  %528 = vst.msk [vmem:[%s1481_s1 + $0x10c] ss:$-48 sm:$0xc] %vm3_vm0, %v24_v15  }
  0x7a   :  { %529 = vst.msk [vmem:[%s1481_s1 + $0x1cc] ss:$-48 sm:$0x30] %vm3_vm0, %v24_v15   ;;  %530 = vst.msk [vmem:[%s1481_s1 + $0x28c] ss:$-48 sm:$0xc0] %vm3_vm0, %v24_v15  }
  0x7b   :  { %537 = vst.msk [vmem:[%s1481_s1 + $0x8] ss:$48 sm:$0x3] %vm3_vm0, %v50_v16   ;;  %538 = vst.msk [vmem:[%s1481_s1 + $0x8] ss:$48 sm:$0xc] %vm3_vm0, %v50_v16  }
  0x7c   :  { %539 = vst.msk [vmem:[%s1481_s1 + $0x8] ss:$48 sm:$0x30] %vm3_vm0, %v50_v16   ;;  %540 = vst.msk [vmem:[%s1481_s1 + $0x8] ss:$48 sm:$0xc0] %vm3_vm0, %v50_v16   ;;  %v62_v17 = vpop.permute.xlu0 %61   ;;  %v75_v18 = vpop.permute.xlu1 %74  }
  0x7d   :  { %541 = vst.msk [vmem:[%s1481_s1 + $0x1] ss:$48 sm:$0x3] %vm3_vm0, %v62_v17   ;;  %542 = vst.msk [vmem:[%s1481_s1 + $0x1] ss:$48 sm:$0xc] %vm3_vm0, %v62_v17  }
  0x7e   :  { %543 = vst.msk [vmem:[%s1481_s1 + $0x1] ss:$48 sm:$0x30] %vm3_vm0, %v62_v17   ;;  %544 = vst.msk [vmem:[%s1481_s1 + $0x1] ss:$48 sm:$0xc0] %vm3_vm0, %v62_v17  }
  0x7f   :  { %546 = vst.msk [vmem:[%s1481_s1 + $0x24] ss:$48 sm:$0x3] %vm3_vm0, %v75_v18   ;;  %547 = vst.msk [vmem:[%s1481_s1 + $0x24] ss:$48 sm:$0xc] %vm3_vm0, %v75_v18  }
  0x80   :  { %548 = vst.msk [vmem:[%s1481_s1 + $0x24] ss:$48 sm:$0x30] %vm3_vm0, %v75_v18   ;;  %549 = vst.msk [vmem:[%s1481_s1 + $0x24] ss:$48 sm:$0xc0] %vm3_vm0, %v75_v18   ;;  %v399_v19 = vpop.permute.xlu0 %398   ;;  %v425_v20 = vpop.permute.xlu1 %424  }
  0x81   :  { %667 = vst.msk [vmem:[%s1481_s1 + $0x29] ss:$48 sm:$0x3] %vm400_vm6, %v399_v19   ;;  %668 = vst.msk [vmem:[%s1481_s1 + $0x29] ss:$48 sm:$0xc] %vm400_vm6, %v399_v19  }
  0x82   :  { %669 = vst.msk [vmem:[%s1481_s1 + $0x29] ss:$48 sm:$0x30] %vm400_vm6, %v399_v19   ;;  %670 = vst.msk [vmem:[%s1481_s1 + $0x29] ss:$48 sm:$0xc0] %vm400_vm6, %v399_v19  }
  0x83   :  { %677 = vst.msk [vmem:[%s1481_s1 + $0x22] ss:$48 sm:$0x3] %vm426_vm7, %v425_v20   ;;  %678 = vst.msk [vmem:[%s1481_s1 + $0x22] ss:$48 sm:$0xc] %vm426_vm7, %v425_v20  }
  0x84   :  { %679 = vst.msk [vmem:[%s1481_s1 + $0x22] ss:$48 sm:$0x30] %vm426_vm7, %v425_v20   ;;  %680 = vst.msk [vmem:[%s1481_s1 + $0x22] ss:$48 sm:$0xc0] %vm426_vm7, %v425_v20   ;;  %v451_v21 = vpop.permute.xlu0 %450   ;;  %v477_v22 = vpop.permute.xlu1 %476  }
  0x85   :  { %671 = vst.msk [vmem:[%s1481_s1 + $0x29] ss:$48 sm:$0x3] %vm409_vm8, %v399_v19   ;;  %672 = vst.msk [vmem:[%s1481_s1 + $0x29] ss:$48 sm:$0xc] %vm409_vm8, %v399_v19  }
  0x86   :  { %673 = vst.msk [vmem:[%s1481_s1 + $0x29] ss:$48 sm:$0x30] %vm409_vm8, %v399_v19   ;;  %674 = vst.msk [vmem:[%s1481_s1 + $0x29] ss:$48 sm:$0xc0] %vm409_vm8, %v399_v19  }
  0x87   :  { %681 = vst.msk [vmem:[%s1481_s1 + $0x22] ss:$48 sm:$0x3] %vm435_vm9, %v425_v20   ;;  %682 = vst.msk [vmem:[%s1481_s1 + $0x22] ss:$48 sm:$0xc] %vm435_vm9, %v425_v20  }
  0x88   :  { %683 = vst.msk [vmem:[%s1481_s1 + $0x22] ss:$48 sm:$0x30] %vm435_vm9, %v425_v20   ;;  %684 = vst.msk [vmem:[%s1481_s1 + $0x22] ss:$48 sm:$0xc0] %vm435_vm9, %v425_v20   ;;  %v502_v23 = vpop.permute.xlu0 %501   ;;  %v88_v24 = vpop.permute.xlu1 %87  }
  0x89   :  { %687 = vst.msk [vmem:[%s1481_s1 + $0x4b] ss:$-48 sm:$0x3] %vm452_vm10, %v451_v21   ;;  %688 = vst.msk [vmem:[%s1481_s1 + $0x10b] ss:$-48 sm:$0xc] %vm452_vm10, %v451_v21  }
  0x8a   :  { %689 = vst.msk [vmem:[%s1481_s1 + $0x1cb] ss:$-48 sm:$0x30] %vm452_vm10, %v451_v21   ;;  %690 = vst.msk [vmem:[%s1481_s1 + $0x28b] ss:$-48 sm:$0xc0] %vm452_vm10, %v451_v21  }
  0x8b   :  { %697 = vst.msk [vmem:[%s1481_s1 + $0xe] ss:$48 sm:$0x3] %vm478_vm11, %v477_v22   ;;  %698 = vst.msk [vmem:[%s1481_s1 + $0xe] ss:$48 sm:$0xc] %vm478_vm11, %v477_v22  }
  0x8c   :  { %699 = vst.msk [vmem:[%s1481_s1 + $0xe] ss:$48 sm:$0x30] %vm478_vm11, %v477_v22   ;;  %700 = vst.msk [vmem:[%s1481_s1 + $0xe] ss:$48 sm:$0xc0] %vm478_vm11, %v477_v22   ;;  %v101_v25 = vpop.permute.xlu0 %100   ;;  %v114_v26 = vpop.permute.xlu1 %113  }
  0x8d   :  { %691 = vst.msk [vmem:[%s1481_s1 + $0x4b] ss:$-48 sm:$0x3] %vm461_vm12, %v451_v21   ;;  %692 = vst.msk [vmem:[%s1481_s1 + $0x10b] ss:$-48 sm:$0xc] %vm461_vm12, %v451_v21  }
  0x8e   :  { %693 = vst.msk [vmem:[%s1481_s1 + $0x1cb] ss:$-48 sm:$0x30] %vm461_vm12, %v451_v21   ;;  %694 = vst.msk [vmem:[%s1481_s1 + $0x28b] ss:$-48 sm:$0xc0] %vm461_vm12, %v451_v21  }
  0x8f   :  { %701 = vst.msk [vmem:[%s1481_s1 + $0xe] ss:$48 sm:$0x3] %vm487_vm13, %v477_v22   ;;  %702 = vst.msk [vmem:[%s1481_s1 + $0xe] ss:$48 sm:$0xc] %vm487_vm13, %v477_v22  }
  0x90   :  { %703 = vst.msk [vmem:[%s1481_s1 + $0xe] ss:$48 sm:$0x30] %vm487_vm13, %v477_v22   ;;  %704 = vst.msk [vmem:[%s1481_s1 + $0xe] ss:$48 sm:$0xc0] %vm487_vm13, %v477_v22   ;;  %v126_v27 = vpop.permute.xlu0 %125   ;;  %v139_v28 = vpop.permute.xlu1 %138  }
  0x91   :  { %706 = vst.msk [vmem:[%s1481_s1 + $0x7] ss:$48 sm:$0x3] %vm503_vm14, %v502_v23   ;;  %707 = vst.msk [vmem:[%s1481_s1 + $0x7] ss:$48 sm:$0xc] %vm503_vm14, %v502_v23  }
  0x92   :  { %708 = vst.msk [vmem:[%s1481_s1 + $0x7] ss:$48 sm:$0x30] %vm503_vm14, %v502_v23   ;;  %709 = vst.msk [vmem:[%s1481_s1 + $0x7] ss:$48 sm:$0xc0] %vm503_vm14, %v502_v23  }
  0x93   :  { %551 = vst.msk [vmem:[%s1481_s1 + $0x4d] ss:$-48 sm:$0x3] %vm3_vm0, %v88_v24   ;;  %552 = vst.msk [vmem:[%s1481_s1 + $0x10d] ss:$-48 sm:$0xc] %vm3_vm0, %v88_v24  }
  0x94   :  { %553 = vst.msk [vmem:[%s1481_s1 + $0x1cd] ss:$-48 sm:$0x30] %vm3_vm0, %v88_v24   ;;  %554 = vst.msk [vmem:[%s1481_s1 + $0x28d] ss:$-48 sm:$0xc0] %vm3_vm0, %v88_v24   ;;  %v152_v29 = vpop.permute.xlu0 %151   ;;  %v165_v30 = vpop.permute.xlu1 %164  }
  0x95   :  { %710 = vst.msk [vmem:[%s1481_s1 + $0x7] ss:$48 sm:$0x3] %vm512_vm15, %v502_v23   ;;  %711 = vst.msk [vmem:[%s1481_s1 + $0x7] ss:$48 sm:$0xc] %vm512_vm15, %v502_v23  }
  0x96   :  { %712 = vst.msk [vmem:[%s1481_s1 + $0x7] ss:$48 sm:$0x30] %vm512_vm15, %v502_v23   ;;  %713 = vst.msk [vmem:[%s1481_s1 + $0x7] ss:$48 sm:$0xc0] %vm512_vm15, %v502_v23  }
  0x97   :  { %556 = vst.msk [vmem:[%s1481_s1 + $0x40] ss:$-48 sm:$0x3] %vm3_vm0, %v101_v25   ;;  %557 = vst.msk [vmem:[%s1481_s1 + $0x100] ss:$-48 sm:$0xc] %vm3_vm0, %v101_v25  }
  0x98   :  { %558 = vst.msk [vmem:[%s1481_s1 + $0x1c0] ss:$-48 sm:$0x30] %vm3_vm0, %v101_v25   ;;  %559 = vst.msk [vmem:[%s1481_s1 + $0x280] ss:$-48 sm:$0xc0] %vm3_vm0, %v101_v25   ;;  %v178_v31 = vpop.permute.xlu0 %177   ;;  %v190_v32 = vpop.permute.xlu1 %189  }
  0x99   :  { %561 = vst.msk [vmem:[%s1481_s1 + $0x9] ss:$48 sm:$0x3] %vm3_vm0, %v114_v26   ;;  %562 = vst.msk [vmem:[%s1481_s1 + $0x9] ss:$48 sm:$0xc] %vm3_vm0, %v114_v26  }
  0x9a   :  { %563 = vst.msk [vmem:[%s1481_s1 + $0x9] ss:$48 sm:$0x30] %vm3_vm0, %v114_v26   ;;  %564 = vst.msk [vmem:[%s1481_s1 + $0x9] ss:$48 sm:$0xc0] %vm3_vm0, %v114_v26  }
  0x9b   :  { %565 = vst.msk [vmem:[%s1481_s1 + $0x2] ss:$48 sm:$0x3] %vm3_vm0, %v126_v27   ;;  %566 = vst.msk [vmem:[%s1481_s1 + $0x2] ss:$48 sm:$0xc] %vm3_vm0, %v126_v27  }
  0x9c   :  { %567 = vst.msk [vmem:[%s1481_s1 + $0x2] ss:$48 sm:$0x30] %vm3_vm0, %v126_v27   ;;  %568 = vst.msk [vmem:[%s1481_s1 + $0x2] ss:$48 sm:$0xc0] %vm3_vm0, %v126_v27   ;;  %v203_v33 = vpop.permute.xlu0 %202   ;;  %v216_v34 = vpop.permute.xlu1 %215  }
  0x9d   :  { %570 = vst.msk [vmem:[%s1481_s1 + $0x25] ss:$48 sm:$0x3] %vm3_vm0, %v139_v28   ;;  %571 = vst.msk [vmem:[%s1481_s1 + $0x25] ss:$48 sm:$0xc] %vm3_vm0, %v139_v28  }
  0x9e   :  { %572 = vst.msk [vmem:[%s1481_s1 + $0x25] ss:$48 sm:$0x30] %vm3_vm0, %v139_v28   ;;  %573 = vst.msk [vmem:[%s1481_s1 + $0x25] ss:$48 sm:$0xc0] %vm3_vm0, %v139_v28  }
  0x9f   :  { %575 = vst.msk [vmem:[%s1481_s1 + $0x4e] ss:$-48 sm:$0x3] %vm3_vm0, %v152_v29   ;;  %576 = vst.msk [vmem:[%s1481_s1 + $0x10e] ss:$-48 sm:$0xc] %vm3_vm0, %v152_v29  }
  0xa0   :  { %577 = vst.msk [vmem:[%s1481_s1 + $0x1ce] ss:$-48 sm:$0x30] %vm3_vm0, %v152_v29   ;;  %578 = vst.msk [vmem:[%s1481_s1 + $0x28e] ss:$-48 sm:$0xc0] %vm3_vm0, %v152_v29   ;;  %v229_v35 = vpop.permute.xlu0 %228   ;;  %v242_v36 = vpop.permute.xlu1 %241  }
  0xa1   :  { %580 = vst.msk [vmem:[%s1481_s1 + $0x41] ss:$-48 sm:$0x3] %vm3_vm0, %v165_v30   ;;  %581 = vst.msk [vmem:[%s1481_s1 + $0x101] ss:$-48 sm:$0xc] %vm3_vm0, %v165_v30  }
  0xa2   :  { %582 = vst.msk [vmem:[%s1481_s1 + $0x1c1] ss:$-48 sm:$0x30] %vm3_vm0, %v165_v30   ;;  %583 = vst.msk [vmem:[%s1481_s1 + $0x281] ss:$-48 sm:$0xc0] %vm3_vm0, %v165_v30  }
  0xa3   :  { %585 = vst.msk [vmem:[%s1481_s1 + $0xa] ss:$48 sm:$0x3] %vm3_vm0, %v178_v31   ;;  %586 = vst.msk [vmem:[%s1481_s1 + $0xa] ss:$48 sm:$0xc] %vm3_vm0, %v178_v31  }
  0xa4   :  { %587 = vst.msk [vmem:[%s1481_s1 + $0xa] ss:$48 sm:$0x30] %vm3_vm0, %v178_v31   ;;  %588 = vst.msk [vmem:[%s1481_s1 + $0xa] ss:$48 sm:$0xc0] %vm3_vm0, %v178_v31   ;;  %v254_v37 = vpop.permute.xlu0 %253   ;;  %v267_v38 = vpop.permute.xlu1 %266  }
  0xa5   :  { %589 = vst.msk [vmem:[%s1481_s1 + $0x3] ss:$48 sm:$0x3] %vm3_vm0, %v190_v32   ;;  %590 = vst.msk [vmem:[%s1481_s1 + $0x3] ss:$48 sm:$0xc] %vm3_vm0, %v190_v32  }
  0xa6   :  { %591 = vst.msk [vmem:[%s1481_s1 + $0x3] ss:$48 sm:$0x30] %vm3_vm0, %v190_v32   ;;  %592 = vst.msk [vmem:[%s1481_s1 + $0x3] ss:$48 sm:$0xc0] %vm3_vm0, %v190_v32  }
  0xa7   :  { %594 = vst.msk [vmem:[%s1481_s1 + $0x26] ss:$48 sm:$0x3] %vm3_vm0, %v203_v33   ;;  %595 = vst.msk [vmem:[%s1481_s1 + $0x26] ss:$48 sm:$0xc] %vm3_vm0, %v203_v33  }
  0xa8   :  { %596 = vst.msk [vmem:[%s1481_s1 + $0x26] ss:$48 sm:$0x30] %vm3_vm0, %v203_v33   ;;  %597 = vst.msk [vmem:[%s1481_s1 + $0x26] ss:$48 sm:$0xc0] %vm3_vm0, %v203_v33   ;;  %v280_v39 = vpop.permute.xlu0 %279   ;;  %v293_v40 = vpop.permute.xlu1 %292  }
  0xa9   :  { %599 = vst.msk [vmem:[%s1481_s1 + $0x4f] ss:$-48 sm:$0x3] %vm3_vm0, %v216_v34   ;;  %600 = vst.msk [vmem:[%s1481_s1 + $0x10f] ss:$-48 sm:$0xc] %vm3_vm0, %v216_v34  }
  0xaa   :  { %601 = vst.msk [vmem:[%s1481_s1 + $0x1cf] ss:$-48 sm:$0x30] %vm3_vm0, %v216_v34   ;;  %602 = vst.msk [vmem:[%s1481_s1 + $0x28f] ss:$-48 sm:$0xc0] %vm3_vm0, %v216_v34  }
  0xab   :  { %604 = vst.msk [vmem:[%s1481_s1 + $0x48] ss:$-48 sm:$0x3] %vm3_vm0, %v229_v35   ;;  %605 = vst.msk [vmem:[%s1481_s1 + $0x108] ss:$-48 sm:$0xc] %vm3_vm0, %v229_v35  }
  0xac   :  { %606 = vst.msk [vmem:[%s1481_s1 + $0x1c8] ss:$-48 sm:$0x30] %vm3_vm0, %v229_v35   ;;  %607 = vst.msk [vmem:[%s1481_s1 + $0x288] ss:$-48 sm:$0xc0] %vm3_vm0, %v229_v35   ;;  %v306_v41 = vpop.permute.xlu0 %305   ;;  %v318_v42 = vpop.permute.xlu1 %317  }
  0xad   :  { %609 = vst.msk [vmem:[%s1481_s1 + $0xb] ss:$48 sm:$0x3] %vm3_vm0, %v242_v36   ;;  %610 = vst.msk [vmem:[%s1481_s1 + $0xb] ss:$48 sm:$0xc] %vm3_vm0, %v242_v36  }
  0xae   :  { %611 = vst.msk [vmem:[%s1481_s1 + $0xb] ss:$48 sm:$0x30] %vm3_vm0, %v242_v36   ;;  %612 = vst.msk [vmem:[%s1481_s1 + $0xb] ss:$48 sm:$0xc0] %vm3_vm0, %v242_v36  }
  0xaf   :  { %613 = vst.msk [vmem:[%s1481_s1 + $0x4] ss:$48 sm:$0x3] %vm3_vm0, %v254_v37   ;;  %614 = vst.msk [vmem:[%s1481_s1 + $0x4] ss:$48 sm:$0xc] %vm3_vm0, %v254_v37  }
  0xb0   :  { %615 = vst.msk [vmem:[%s1481_s1 + $0x4] ss:$48 sm:$0x30] %vm3_vm0, %v254_v37   ;;  %616 = vst.msk [vmem:[%s1481_s1 + $0x4] ss:$48 sm:$0xc0] %vm3_vm0, %v254_v37   ;;  %v331_v43 = vpop.permute.xlu0 %330   ;;  %v344_v44 = vpop.permute.xlu1 %343  }
  0xb1   :  { %618 = vst.msk [vmem:[%s1481_s1 + $0x27] ss:$48 sm:$0x3] %vm3_vm0, %v267_v38   ;;  %619 = vst.msk [vmem:[%s1481_s1 + $0x27] ss:$48 sm:$0xc] %vm3_vm0, %v267_v38  }
  0xb2   :  { %620 = vst.msk [vmem:[%s1481_s1 + $0x27] ss:$48 sm:$0x30] %vm3_vm0, %v267_v38   ;;  %621 = vst.msk [vmem:[%s1481_s1 + $0x27] ss:$48 sm:$0xc0] %vm3_vm0, %v267_v38  }
  0xb3   :  { %623 = vst.msk [vmem:[%s1481_s1 + $0x20] ss:$48 sm:$0x3] %vm3_vm0, %v280_v39   ;;  %624 = vst.msk [vmem:[%s1481_s1 + $0x20] ss:$48 sm:$0xc] %vm3_vm0, %v280_v39  }
  0xb4   :  { %625 = vst.msk [vmem:[%s1481_s1 + $0x20] ss:$48 sm:$0x30] %vm3_vm0, %v280_v39   ;;  %626 = vst.msk [vmem:[%s1481_s1 + $0x20] ss:$48 sm:$0xc0] %vm3_vm0, %v280_v39   ;;  %v357_v45 = vpop.permute.xlu0 %356   ;;  %v370_v46 = vpop.permute.xlu1 %369  }
  0xb5   :  { %628 = vst.msk [vmem:[%s1481_s1 + $0x49] ss:$-48 sm:$0x3] %vm3_vm0, %v293_v40   ;;  %629 = vst.msk [vmem:[%s1481_s1 + $0x109] ss:$-48 sm:$0xc] %vm3_vm0, %v293_v40  }
  0xb6   :  { %630 = vst.msk [vmem:[%s1481_s1 + $0x1c9] ss:$-48 sm:$0x30] %vm3_vm0, %v293_v40   ;;  %631 = vst.msk [vmem:[%s1481_s1 + $0x289] ss:$-48 sm:$0xc0] %vm3_vm0, %v293_v40  }
  0xb7   :  { %633 = vst.msk [vmem:[%s1481_s1 + $0xc] ss:$48 sm:$0x3] %vm3_vm0, %v306_v41   ;;  %634 = vst.msk [vmem:[%s1481_s1 + $0xc] ss:$48 sm:$0xc] %vm3_vm0, %v306_v41  }
  0xb8   :  { %635 = vst.msk [vmem:[%s1481_s1 + $0xc] ss:$48 sm:$0x30] %vm3_vm0, %v306_v41   ;;  %636 = vst.msk [vmem:[%s1481_s1 + $0xc] ss:$48 sm:$0xc0] %vm3_vm0, %v306_v41   ;;  %v382_v47 = vpop.permute.xlu0 %381  }
  0xb9   :  { %637 = vst.msk [vmem:[%s1481_s1 + $0x5] ss:$48 sm:$0x3] %vm3_vm0, %v318_v42   ;;  %638 = vst.msk [vmem:[%s1481_s1 + $0x5] ss:$48 sm:$0xc] %vm3_vm0, %v318_v42  }
  0xba   :  { %639 = vst.msk [vmem:[%s1481_s1 + $0x5] ss:$48 sm:$0x30] %vm3_vm0, %v318_v42   ;;  %640 = vst.msk [vmem:[%s1481_s1 + $0x5] ss:$48 sm:$0xc0] %vm3_vm0, %v318_v42  }
  0xbb   :  { %642 = vst.msk [vmem:[%s1481_s1 + $0x28] ss:$48 sm:$0x3] %vm3_vm0, %v331_v43   ;;  %643 = vst.msk [vmem:[%s1481_s1 + $0x28] ss:$48 sm:$0xc] %vm3_vm0, %v331_v43  }
  0xbc   :  { %644 = vst.msk [vmem:[%s1481_s1 + $0x28] ss:$48 sm:$0x30] %vm3_vm0, %v331_v43   ;;  %645 = vst.msk [vmem:[%s1481_s1 + $0x28] ss:$48 sm:$0xc0] %vm3_vm0, %v331_v43  }
  0xbd   :  { %647 = vst.msk [vmem:[%s1481_s1 + $0x21] ss:$48 sm:$0x3] %vm3_vm0, %v344_v44   ;;  %648 = vst.msk [vmem:[%s1481_s1 + $0x21] ss:$48 sm:$0xc] %vm3_vm0, %v344_v44  }
  0xbe   :  { %649 = vst.msk [vmem:[%s1481_s1 + $0x21] ss:$48 sm:$0x30] %vm3_vm0, %v344_v44   ;;  %650 = vst.msk [vmem:[%s1481_s1 + $0x21] ss:$48 sm:$0xc0] %vm3_vm0, %v344_v44  }
  0xbf   :  { %652 = vst.msk [vmem:[%s1481_s1 + $0x4a] ss:$-48 sm:$0x3] %vm3_vm0, %v357_v45   ;;  %653 = vst.msk [vmem:[%s1481_s1 + $0x10a] ss:$-48 sm:$0xc] %vm3_vm0, %v357_v45  }
  0xc0   :  { %654 = vst.msk [vmem:[%s1481_s1 + $0x1ca] ss:$-48 sm:$0x30] %vm3_vm0, %v357_v45   ;;  %655 = vst.msk [vmem:[%s1481_s1 + $0x28a] ss:$-48 sm:$0xc0] %vm3_vm0, %v357_v45  }
  0xc1   :  { %657 = vst.msk [vmem:[%s1481_s1 + $0xd] ss:$48 sm:$0x3] %vm3_vm0, %v370_v46   ;;  %658 = vst.msk [vmem:[%s1481_s1 + $0xd] ss:$48 sm:$0xc] %vm3_vm0, %v370_v46  }
  0xc2   :  { %659 = vst.msk [vmem:[%s1481_s1 + $0xd] ss:$48 sm:$0x30] %vm3_vm0, %v370_v46   ;;  %660 = vst.msk [vmem:[%s1481_s1 + $0xd] ss:$48 sm:$0xc0] %vm3_vm0, %v370_v46  }
  0xc3   :  { %661 = vst.msk [vmem:[%s1481_s1 + $0x6] ss:$48 sm:$0x3] %vm3_vm0, %v382_v47   ;;  %662 = vst.msk [vmem:[%s1481_s1 + $0x6] ss:$48 sm:$0xc] %vm3_vm0, %v382_v47  }
  0xc4   :  { %663 = vst.msk [vmem:[%s1481_s1 + $0x6] ss:$48 sm:$0x30] %vm3_vm0, %v382_v47   ;;  %664 = vst.msk [vmem:[%s1481_s1 + $0x6] ss:$48 sm:$0xc0] %vm3_vm0, %v382_v47  }

// kernel: cyclegan_forward.1
= control target key start
LH: loop header
LB: loop body
LE: loop exit
PB: predicated region body
PF: predicated region fallthrough
CT: control target
= control target key end

     0   :  { %s2548_s27 = smov 0   ;;  %s3164_s0 = inlined_call_operand.vmem [shape: f32[1,648], index: 0, kind: input, shape index: {}]   ;;  %s3165_s1 = inlined_call_operand.vmem [shape: bf16[2,8,904], index: 1, kind: input, shape index: {}]   ;;  %s3166_s2 = inlined_call_operand.vmem [shape: bf16[2,8,72], index: 2, kind: input, shape index: {}]   ;;  %s3167_s3 = inlined_call_operand.vmem [shape: bf16[2,8,72], index: 3, kind: input, shape index: {}]   ;;  %s3168_s4 = inlined_call_operand.vmem [shape: bf16[2,8,72], index: 4, kind: input, shape index: {}]   ;;  %s3169_s5 = inlined_call_operand.vmem [shape: f32[2,8,1], index: 5, kind: input, shape index: {}]   ;;  %s3170_s6 = inlined_call_operand.vmem [shape: f32[2,8,1], index: 6, kind: input, shape index: {}]   ;;  %s3171_s7 = inlined_call_operand.vmem [shape: f32[2,8,1], index: 7, kind: input, shape index: {}]   ;;  %s3172_s8 = inlined_call_operand.vmem [shape: f32[2,8,648], index: 8, kind: output, shape index: {}]  }
   0x1 LB: > { %s2275_s28 = sadd.s32 4294967295, %s2492_s27   ;;  %p2279_p0 = scmp.ge.s32.totalorder %s2492_s27, 1  ;;  %s2492_s27 = sphi %s2548_s27, %s18_s27  }
   0x2   : > { %p316_p1 = scmp.lt.s32.totalorder %s2492_s27, 3 }
   0x4   : > { %p317_p2 = pnand %p2279_p0, %p316_p1 }
   0x5   : > { %p374_p3 = scmp.lt.s32.totalorder (!%p317_p2), %s2275_s28, 1  ;;  %s2494_s11 = smov (!%p317_p2), 109  }
   0x6   : > { %320 = sbr.rel (%p317_p2) target bundleno = 1153 (0x481), region = 52  ;;  %s2495_s12 = smov (!%p317_p2), 111  }
   0x7   : > { %s2496_s13 = smov (!%p317_p2), 110   ;;  %s2497_s14 = smov (!%p317_p2), 127  }
   0x8   : > { %s2498_s15 = smov (!%p317_p2), 17   ;;  %s2499_s16 = smov (!%p317_p2), 1  }
   0x9   : > { %s2500_s17 = smov (!%p317_p2), 19   ;;  %s2501_s18 = smov (!%p317_p2), 18  }
   0xb   : > { %s3176_s28 = smov (!%p374_p3, %s2275_s28), 1  ;;  %vm430_vm0 = vcmask 1043456   ;;  %vm412_vm1 = vcmask 64516   ;;  %v2502_v6 = vmov 0   ;;  %vm635_vm3 = vcmask 891904  }
   0xc   : > { %s2405_s29 = sshll.u32 %s3176_s28, 5  ;;  %vm2593_vm2 = vmor %vm412_vm1, %vm430_vm0  ;;  %410 = vst [vmem:[#allocation2] sm:$0xf] %v2502_v6  ;;  %869 = vmatprep.mubr.bf16.mxu0 %v2502_v6  ;;  %910 = vmatprep.mubr.bf16.mxu1 %v2502_v6  ;;  %s2622_s19 = sshll.u32 %s3176_s28, 3  ;;  %vm581_vm4 = vcmask 908288   ;;  %vm608_vm5 = vcmask 900096  }
   0xd   : > { %s2562_s10 = scalar_lea.vmem %s3165_s1, %s2405_s29  ;;  %2430 = vset.pattern.permute.xlu1 %v2502_v6  ;;  %2431 = vset.pattern.permute.xlu0 %v2502_v6  ;;  %s394_s22 = scalar_lea.vmem %s3169_s5, %s2622_s19  ;;  %vm554_vm6 = vcmask 1039360   ;;  %vm488_vm7 = vcmask 138240   ;;  %vm520_vm8 = vcmask 7168   ;;  %vm432_vm9 = vcmask 154624  }
   0xe   : > { %v2565_v0 = vld [vmem:[%s2562_s10 + $0x4] sm:$0xff]  ;;  %v2572_v1 = vld [vmem:[%s2562_s10 + $0xc] sm:$0xff]  ;;  %v567_v4 = vld [vmem:[%s2562_s10 + $0x14] sm:$0xff]  ;;  %vm461_vm10 = vcmask 146432   ;;  %s2687_s23 = sshll.u32 %s3176_s28, 2  ;;  %vm815_vm11 = vcmask 588800   ;;  %s398_s20 = scalar_lea.vmem %s3170_s6, %s2622_s19 }
   0xf   : > { %625 = vrot.lane.b32.xlu0 %v2565_v0, %s2494_s11  ;;  %571 = vrot.lane.b32.xlu1 %v2565_v0, %s2495_s12  ;;  %v473_v2 = vld [vmem:[%s2562_s10 + $0x8] sm:$0xff]  ;;  %v472_v3 = vld [vmem:[%s2562_s10] sm:$0xff]  ;;  %537 = vst.msk [vmem:[#allocation3 + $0x70] sm:$0xff] %vm2593_vm2, %v567_v4  ;;  %s382_s26 = scalar_lea.vmem %s3166_s2, %s2687_s23  ;;  %vm411_vm12 = vcmask 1043520   ;;  %s386_s24 = scalar_lea.vmem %s3167_s3, %s2687_s23  ;;  %vm2146_vm14 = vcmask 64512  }
  0x10   : > { %v501_v7 = vld [vmem:[%s2562_s10 + $0x10] sm:$0xff]  ;;  %v502_v8 = vld [vmem:[%s2562_s10 + $0x18] sm:$0xf]  ;;  %v674_v9 = vld [vmem:[%s394_s22] sm:$0xff]  ;;  %s402_s29 = scalar_lea.vmem %s3171_s7, %s2622_s19 }
  0x11   : > { %vm413_vm13 = vmor %vm412_vm1, %vm411_vm12 }
  0x12   : > { %414 = vst.msk [vmem:[#allocation2 + $0x18] sm:$0xff] %vm413_vm13, %v2502_v6 }
  0x13   : > { %627 = vrot.lane.b32.xlu0 %v2572_v1, %s2494_s11  ;;  %573 = vrot.lane.b32.xlu1 %v2572_v1, %s2495_s12 }
  0x17   : > { %598 = vrot.lane.b32.xlu0 %v2565_v0, %s2496_s13  ;;  %600 = vrot.lane.b32.xlu1 %v2572_v1, %s2496_s13 }
  0x1b   : > { %546 = vrot.lane.b32.xlu1 %v2572_v1, %s2497_s14  ;;  %544 = vrot.lane.b32.xlu0 %v2565_v0, %s2497_s14 }
  0x1f   : > { %480 = vrot.lane.b32.xlu1 %v473_v2, %s2498_s15  ;;  %478 = vrot.lane.b32.xlu0 %v472_v3, %s2498_s15 }
  0x23   : > { %509 = vrot.lane.b32.xlu1 %v473_v2, %s2499_s16  ;;  %507 = vrot.lane.b32.xlu0 %v472_v3, %s2499_s16 }
  0x27   : > { %423 = vrot.lane.b32.xlu1 %v473_v2, %s2500_s17  ;;  %421 = vrot.lane.b32.xlu0 %v472_v3, %s2500_s17 }
  0x2b   : > { %453 = vrot.lane.b32.xlu1 %v473_v2, %s2501_s18  ;;  %451 = vrot.lane.b32.xlu0 %v472_v3, %s2501_s18 }
  0x2f   : > { %575 = vrot.lane.b32.xlu1 %v567_v4, %s2495_s12  ;;  %629 = vrot.lane.b32.xlu0 %v567_v4, %s2494_s11 }
  0x33   : > { %548 = vrot.lane.b32.xlu1 %v567_v4, %s2497_s14  ;;  %602 = vrot.lane.b32.xlu0 %v567_v4, %s2496_s13 }
  0x37   : > { %511 = vrot.lane.b32.xlu1 %v501_v7, %s2499_s16  ;;  %482 = vrot.lane.b32.xlu0 %v501_v7, %s2498_s15 }
  0x3b   : > { %425 = vrot.lane.b32.xlu1 %v501_v7, %s2500_s17  ;;  %513 = vrot.lane.b32.xlu0 %v502_v8, %s2499_s16 }
  0x3f   : > { %455 = vrot.lane.b32.xlu0 %v501_v7, %s2501_s18  ;;  %677 = vperm.xlu1 %2430, %v674_v9  }
  0x81   : > { %v626_v10 = vpop.permute.xlu0 %625  ;;  %v572_v11 = vpop.permute.xlu1 %571 }
  0x82   : > { %v577_v12 = vrot.slane %v572_v11, 4  ;;  %v631_v15 = vrot.slane %v626_v10, 4 }
  0x85   : > { %v2628_v13 = vpop.permute.xlu0 %627  ;;  %v2630_v14 = vpop.permute.xlu1 %573 }
  0x86   : > { %v632_v16 = vrot.slane %v2628_v13, 4  ;;  %v578_v17 = vrot.slane %v2630_v14, 4 }
  0x88   : > { %v634_v18 = vsel %vm430_vm0, %v631_v15, %v632_v16  ;;  %v580_v20 = vsel %vm430_vm0, %v577_v12, %v578_v17 }
  0x89   : > { %v636_v19 = vsel %vm635_vm3, %v626_v10, %v634_v18  ;;  %v599_v21 = vpop.permute.xlu0 %598  ;;  %v2641_v22 = vpop.permute.xlu1 %600  ;;  %v582_v29 = vsel %vm581_vm4, %v572_v11, %v580_v20 }
  0x8a   : > { %v604_v23 = vrot.slane %v599_v21, 4  ;;  %v605_v24 = vrot.slane %v2641_v22, 4  ;;  %v2314_v25 = vcombine.high %v636_v19, %v636_v19  ;;  %v2313_v26 = vcombine.low %v636_v19, %v636_v19 }
  0x8c   : > { %v607_v27 = vsel %vm430_vm0, %v604_v23, %v605_v24  ;;  %2319 = vmatprep.subr.msk.bf16.mxu0 %vm430_vm0, %v2314_v25  ;;  %v820_v28 = vsel %vm430_vm0, %v2313_v26, 0 }
  0x8d   : > { %v609_v30 = vsel %vm608_vm5, %v599_v21, %v607_v27  ;;  %v2651_v31 = vpop.permute.xlu1 %546  ;;  %v545_v32 = vpop.permute.xlu0 %544  ;;  %844 = vmatpush1.bf16.msra.mxu0 %v820_v28  ;;  %v2709_v27 = vld [vmem:[%s382_s26] sm:$0xf] }
  0x8e   : > { %v551_v33 = vrot.slane %v2651_v31, 4  ;;  %v550_v34 = vrot.slane %v545_v32, 4  ;;  %v2308_v35 = vcombine.high %v582_v29, %v609_v30  ;;  %v2307_v36 = vcombine.low %v582_v29, %v609_v30 }
  0x90   : > { %v553_v37 = vsel %vm430_vm0, %v550_v34, %v551_v33  ;;  %845 = vmatprep.subr.bf16.mxu0 %v2308_v35 }
  0x91   : > { %v555_v38 = vsel %vm554_vm6, %v545_v32, %v553_v37  ;;  %v2658_v39 = vpop.permute.xlu1 %480  ;;  %v479_v40 = vpop.permute.xlu0 %478  ;;  %846 = vmatpush1.bf16.msra.mxu0 %v2307_v36 }
  0x92   : > { %v485_v41 = vrot.slane %v2658_v39, 4  ;;  %v484_v42 = vrot.slane %v479_v40, 4  ;;  %v2302_v43 = vcombine.high %v2565_v0, %v555_v38  ;;  %v2301_v44 = vcombine.low %v2565_v0, %v555_v38 }
  0x94   : > { %847 = vmatprep.subr.bf16.mxu0 %v2302_v43  ;;  %v487_v47 = vsel %vm430_vm0, %v484_v42, %v485_v41 }
  0x95   : > { %v2663_v45 = vpop.permute.xlu1 %509  ;;  %v508_v46 = vpop.permute.xlu0 %507  ;;  %848 = vmatpush1.bf16.msra.mxu0 %v2301_v44  ;;  %v489_v51 = vsel %vm488_vm7, %v479_v40, %v487_v47 }
  0x96   : > { %v516_v48 = vrot.slane %v2663_v45, 4  ;;  %v515_v49 = vrot.slane %v508_v46, 4 }
  0x98   : > { %v519_v50 = vsel %vm430_vm0, %v515_v49, %v516_v48 }
  0x99   : > { %v521_v52 = vsel %vm520_vm8, %v508_v46, %v519_v50  ;;  %v2674_v53 = vpop.permute.xlu1 %423  ;;  %v422_v54 = vpop.permute.xlu0 %421 }
  0x9a   : > { %v428_v55 = vrot.slane %v2674_v53, 4  ;;  %v427_v56 = vrot.slane %v422_v54, 4  ;;  %v2296_v57 = vcombine.high %v489_v51, %v521_v52  ;;  %v2295_v58 = vcombine.low %v489_v51, %v521_v52 }
  0x9c   : > { %849 = vmatprep.subr.bf16.mxu0 %v2296_v57  ;;  %v431_v61 = vsel %vm430_vm0, %v427_v56, %v428_v55 }
  0x9d   : > { %v2677_v59 = vpop.permute.xlu1 %453  ;;  %v452_v60 = vpop.permute.xlu0 %451  ;;  %850 = vmatpush1.bf16.msra.mxu0 %v2295_v58  ;;  %v433_v2 = vsel %vm432_vm9, %v422_v54, %v431_v61 }
  0x9e   : > { %v458_v62 = vrot.slane %v2677_v59, 4  ;;  %v457_v63 = vrot.slane %v452_v60, 4 }
  0xa0   : > { %v460_v0 = vsel %vm430_vm0, %v457_v63, %v458_v62 }
  0xa1   : > { %v462_v3 = vsel %vm461_vm10, %v452_v60, %v460_v0  ;;  %v576_v4 = vpop.permute.xlu1 %575  ;;  %v630_v7 = vpop.permute.xlu0 %629 }
  0xa2   : > { %v579_v8 = vrot.slane %v576_v4, 4  ;;  %v633_v9 = vrot.slane %v630_v7, 4  ;;  %v2290_v10 = vcombine.high %v433_v2, %v462_v3  ;;  %v2289_v11 = vcombine.low %v433_v2, %v462_v3 }
  0xa4   : > { %v585_v12 = vsel %vm581_vm4, %v576_v4, %v579_v8  ;;  %v637_v15 = vsel %vm430_vm0, %v632_v16, %v633_v9  ;;  %v639_v18 = vsel %vm635_vm3, %v630_v7, %v633_v9  ;;  %851 = vmatprep.subr.bf16.mxu0 %v2290_v10  ;;  %v583_v19 = vsel %vm430_vm0, %v578_v17, %v579_v8 }
  0xa5   : > { %591 = vst.msk [vmem:[#allocation3 + $0xa0] sm:$0xff] %vm2593_vm2, %v585_v12  ;;  %v638_v20 = vsel %vm635_vm3, %v2628_v13, %v637_v15  ;;  %645 = vst.msk [vmem:[#allocation3 + $0xd0] sm:$0xff] %vm2593_vm2, %v639_v18  ;;  %v549_v21 = vpop.permute.xlu1 %548  ;;  %v603_v23 = vpop.permute.xlu0 %602  ;;  %852 = vmatpush1.bf16.msra.mxu0 %v2289_v11  ;;  %v584_v32 = vsel %vm581_vm4, %v2630_v14, %v583_v19 }
  0xa6   : > { %v552_v16 = vrot.slane %v549_v21, 4  ;;  %v606_v25 = vrot.slane %v603_v23, 4  ;;  %v2316_v26 = vcombine.high %v638_v20, %v638_v20  ;;  %v2315_v28 = vcombine.low %v638_v20, %v638_v20 }
  0xa8   : > { %v556_v17 = vsel %vm430_vm0, %v551_v33, %v552_v16  ;;  %v558_v29 = vsel %vm554_vm6, %v549_v21, %v552_v16  ;;  %v610_v13 = vsel %vm430_vm0, %v605_v24, %v606_v25  ;;  %v612_v30 = vsel %vm608_vm5, %v603_v23, %v606_v25  ;;  %2321 = vmatprep.subr.msk.bf16.mxu1 %vm430_vm0, %v2316_v26  ;;  %v409_v21 = vld [vmem:[%s3164_s0] sm:$0x3f] }
  0xa9   : > { %v557_v34 = vsel %vm554_vm6, %v2651_v31, %v556_v17  ;;  %564 = vst.msk [vmem:[#allocation3 + $0x88] sm:$0xff] %vm2593_vm2, %v558_v29  ;;  %v611_v33 = vsel %vm608_vm5, %v2641_v22, %v610_v13  ;;  %618 = vst.msk [vmem:[#allocation3 + $0xb8] sm:$0xff] %vm2593_vm2, %v612_v30  ;;  %v512_v24 = vpop.permute.xlu1 %511  ;;  %v483_v35 = vpop.permute.xlu0 %482  ;;  %2320 = vmatmul.mubr.msk.bf16.vlgmr.msra.gmra.mxu0 %vm815_vm11, %v2709_v27  ;;  %v826_v36 = vsel %vm430_vm0, %v2315_v28, 0 }
  0xaa   : > { %v517_v14 = vrot.slane %v512_v24, 4  ;;  %v486_v37 = vrot.slane %v483_v35, 4  ;;  %885 = vmatpush1.bf16.msra.mxu1 %v826_v36  ;;  %v2310_v31 = vcombine.high %v584_v32, %v611_v33  ;;  %v2309_v38 = vcombine.low %v584_v32, %v611_v33  ;;  %951 = vmatprep.mubr.bf16.mxu0 %v2502_v6 }
  0xab   : > { %v2304_v50 = vcombine.high %v2572_v1, %v557_v34  ;;  %v2303_v60 = vcombine.low %v2572_v1, %v557_v34 }
  0xac   : > { %v522_v22 = vsel %vm430_vm0, %v516_v48, %v517_v14  ;;  %v490_v40 = vsel %vm430_vm0, %v485_v41, %v486_v37  ;;  %v492_v42 = vsel %vm488_vm7, %v483_v35, %v486_v37  ;;  %v673_v43 = vld [vmem:[#allocation3 + $0xd0] sm:$0xff]  ;;  %886 = vmatprep.subr.bf16.mxu1 %v2310_v31 }
  0xad   : > { %498 = vst.msk [vmem:[#allocation3 + $0x40] sm:$0xff] %vm2593_vm2, %v492_v42  ;;  %v426_v44 = vpop.permute.xlu1 %425  ;;  %v514_v46 = vpop.permute.xlu0 %513  ;;  %v2318_v47 = vcombine.high %v673_v43, %v673_v43  ;;  %v2317_v49 = vcombine.low %v673_v43, %v673_v43  ;;  %v523_v48 = vsel %vm520_vm8, %v2663_v45, %v522_v22  ;;  %v491_v51 = vsel %vm488_vm7, %v2658_v39, %v490_v40 }
  0xae   : > { %v429_v41 = vrot.slane %v426_v44, 4  ;;  %v518_v52 = vrot.slane %v514_v46, 4  ;;  %887 = vmatpush1.bf16.msra.mxu1 %v2309_v38  ;;  %v2298_v63 = vcombine.high %v491_v51, %v523_v48  ;;  %v2297_v7 = vcombine.low %v491_v51, %v523_v48 }
  0xaf   : > { %2323 = vmatprep.subr.msk.bf16.mxu0 %vm430_vm0, %v2318_v47  ;;  %v832_v54 = vsel %vm430_vm0, %v2317_v49, 0  ;;  %888 = vmatprep.subr.bf16.mxu1 %v2304_v50 }
  0xb0   : > { %v436_v56 = vsel %vm432_vm9, %v426_v44, %v429_v41  ;;  %v524_v57 = vsel %vm430_vm0, %v517_v14, %v518_v52  ;;  %926 = vmatpush1.bf16.msra.mxu0 %v832_v54  ;;  %v2434_v58 = vld [vmem:[#allocation3 + $0xa4] ss:$24 sps:$4 sm:$0xff]   ;;  %v2437_v61 = vld [vmem:[#allocation3 + $0x74] ss:$24 sps:$4 sm:$0xff]   ;;  %v434_v0 = vsel %vm430_vm0, %v428_v55, %v429_v41  ;;  %v2436_v3 = vld [vmem:[#allocation3 + $0xa0] ss:$24 sps:$4 sm:$0xff]  }
  0xb1   : > { %444 = vst.msk [vmem:[#allocation3 + $0x10] sm:$0xff] %vm2593_vm2, %v436_v56  ;;  %v525_v39 = vsel %vm520_vm8, %v512_v24, %v524_v57  ;;  %v456_v45 = vpop.permute.xlu0 %455  ;;  %927 = vmatprep.subr.bf16.mxu0 %v2434_v58  ;;  %v435_v8 = vsel %vm432_vm9, %v2674_v53, %v434_v0  ;;  %v2439_v9 = vld [vmem:[#allocation3 + $0x70] ss:$24 sps:$4 sm:$0xff]  }
  0xb2   : > { %531 = vst.msk [vmem:[#allocation3 + $0x58] sm:$0xff] %vm2593_vm2, %v525_v39  ;;  %v459_v2 = vrot.slane %v456_v45, 4  ;;  %889 = vmatpush1.bf16.msra.mxu1 %v2303_v60 }
  0xb3   : > { %890 = vmatprep.subr.bf16.mxu1 %v2298_v63 }
  0xb4   : > { %v463_v1 = vsel %vm430_vm0, %v458_v62, %v459_v2  ;;  %v465_v4 = vsel %vm461_vm10, %v456_v45, %v459_v2  ;;  %928 = vmatpush1.bf16.msra.mxu0 %v2436_v3 }
  0xb5   : > { %v464_v55 = vsel %vm461_vm10, %v2677_v59, %v463_v1  ;;  %471 = vst.msk [vmem:[#allocation3 + $0x28] sm:$0xff] %vm2593_vm2, %v465_v4  ;;  %929 = vmatprep.subr.bf16.mxu0 %v2437_v61  ;;  %v967_v59 = vlaneseq }
  0xb6   : > { %891 = vmatpush1.bf16.msra.mxu1 %v2297_v7  ;;  %v2292_v10 = vcombine.high %v435_v8, %v464_v55  ;;  %v2291_v11 = vcombine.low %v435_v8, %v464_v55  ;;  %v1278_v55 = vld [vmem:[%s398_s20] sm:$0xff] }
  0xb7   : > { %v968_v18 = vshrl.u32 %v967_v59, 7 }
  0xb8   : > { %930 = vmatpush1.bf16.msra.mxu0 %v2439_v9  ;;  %892 = vmatprep.subr.bf16.mxu1 %v2292_v10 }
  0xb9   : > { %v2440_v62 = vld [vmem:[#allocation3 + $0x44] ss:$24 sps:$4 sm:$0xff]   ;;  %v2442_v12 = vld [vmem:[#allocation3 + $0x40] ss:$24 sps:$4 sm:$0xff]   ;;  %v969_v19 = vsub.s32 0, %v968_v18  ;;  %v973_v23 = vsub.s32 1, %v968_v18 }
  0xba   : > { %893 = vmatpush1.bf16.msra.mxu1 %v2291_v11  ;;  %931 = vmatprep.subr.bf16.mxu0 %v2440_v62  ;;  %v678_v20 = vpop.permute.xlu1 %677  ;;  %v977_v35 = vsub.s32 2, %v968_v18  ;;  %v981_v36 = vsub.s32 3, %v968_v18  ;;  %v985_v43 = vsub.s32 4, %v968_v18  ;;  %v989_v47 = vsub.s32 5, %v968_v18 }
  0xbb   : > { %v2782_v26 = vrot.slane %v409_v21, %v969_v19  ;;  %v2784_v29 = vrot.slane %v409_v21, %v973_v23 }
  0xbc   : > { %932 = vmatpush1.bf16.msra.mxu0 %v2442_v12  ;;  %v2443_v15 = vld [vmem:[#allocation3 + $0x14] ss:$24 sps:$4 sm:$0xff]   ;;  %v2445_v53 = vld [vmem:[#allocation3 + $0x10] ss:$24 sps:$4 sm:$0xff]   ;;  %v2793_v22 = vrot.slane %v409_v21, %v977_v35  ;;  %v2795_v42 = vrot.slane %v409_v21, %v981_v36  ;;  %v2799_v52 = vrot.slane %v409_v21, %v985_v43  ;;  %v2803_v60 = vrot.slane %v409_v21, %v989_v47 }
  0xbd   : > { %2322 = vmatmul.mubr.msk.bf16.vlgmr.msra.gmra.mxu1 %vm815_vm11, %v2709_v27  ;;  %933 = vmatprep.subr.bf16.mxu0 %v2443_v15 }
  0xbe   : > { %1472 = vmatprep.mubr.bf16.mxu1 %v2502_v6 }
  0xc0   : > { %934 = vmatpush1.bf16.msra.mxu0 %v2445_v53 }
  0xc3   : > { %2324 = vmatmul.mubr.msk.bf16.vlgmr.msra.gmra.mxu0 %vm815_vm11, %v2709_v27 }
  0xc4   : > { %1513 = vmatprep.mubr.bf16.mxu0 %v2502_v6 }
 0x169   : > { %v871_v16 = vpop.f32.mrf.mxu0 }
 0x16a   : > { %v872_v25 = vadd.f32 %v871_v16, %v678_v20 }
 0x16b   : > { %v873_v27 = vpop.f32.mrf.mxu0 }
 0x16c   : > { %v874_v28 = vadd.f32 %v873_v27, %v678_v20  ;;  %v960_v17 = vmax.f32 %v872_v25, 0.0 }
 0x16d   : > { %v875_v13 = vpop.f32.mrf.mxu0 }
 0x16e   : > { %v961_v30 = vmax.f32 %v874_v28, 0.0  ;;  %v997_v32 = vmul.f32 %v2782_v26, %v960_v17 }
 0x16f   : > { %v876_v34 = vpop.f32.mrf.mxu0 }
 0x170   : > { %v998_v33 = vmul.f32 %v2784_v29, %v961_v30 }
 0x172   : > { %v2788_v24 = vpack.c.bf16 %v998_v33, %v997_v32 }
 0x174   : > { %1027 = vst [vmem:[#allocation2 + $0x4] sm:$0xff] %v2788_v24  ;;  %1230 = vrot.lane.b32.xlu0 %v2788_v24, %s2494_s11 }
 0x17b   : > { %v1082_v3 = vld [vmem:[#allocation2] sm:$0xff] }
 0x17d   : > { %v912_v14 = vpop.f32.mrf.mxu1 }
 0x17e   : > { %v913_v37 = vadd.f32 %v912_v14, %v678_v20 }
 0x17f   : > { %v914_v31 = vpop.f32.mrf.mxu1 }
 0x180   : > { %v962_v38 = vmax.f32 %v913_v37, 0.0  ;;  %v915_v40 = vadd.f32 %v914_v31, %v678_v20 }
 0x181   : > { %v916_v44 = vpop.f32.mrf.mxu1 }
 0x182   : > { %v963_v46 = vmax.f32 %v915_v40, 0.0  ;;  %v999_v48 = vmul.f32 %v2793_v22, %v962_v38 }
 0x183   : > { %v953_v49 = vpop.f32.mrf.mxu0  ;;  %v917_v50 = vpop.f32.mrf.mxu1 }
 0x184   : > { %v954_v51 = vadd.f32 %v953_v49, %v678_v20  ;;  %v1000_v41 = vmul.f32 %v2795_v42, %v963_v46 }
 0x185   : > { %v955_v54 = vpop.f32.mrf.mxu0 }
 0x186   : > { %v964_v56 = vmax.f32 %v954_v51, 0.0  ;;  %v2801_v57 = vpack.c.bf16 %v1000_v41, %v999_v48  ;;  %v956_v58 = vadd.f32 %v955_v54, %v678_v20 }
 0x187   : > { %v957_v39 = vpop.f32.mrf.mxu0 }
 0x188   : > { %1028 = vst [vmem:[#allocation2 + $0xc] sm:$0xff] %v2801_v57  ;;  %v965_v45 = vmax.f32 %v956_v58, 0.0  ;;  %1232 = vrot.lane.b32.xlu1 %v2801_v57, %s2494_s11  ;;  %1180 = vrot.lane.b32.xlu0 %v2801_v57, %s2495_s12  ;;  %v1001_v63 = vmul.f32 %v2799_v52, %v964_v56 }
 0x189   : > { %v958_v61 = vpop.f32.mrf.mxu0 }
 0x18a   : > { %v1002_v0 = vmul.f32 %v2803_v60, %v965_v45 }
 0x18c   : > { %v2408_v2 = vpack.c.bf16 %v1002_v0, %v1001_v63  ;;  %1178 = vrot.lane.b32.xlu1 %v2788_v24, %s2495_s12  ;;  %1204 = vrot.lane.b32.xlu0 %v2788_v24, %s2496_s13 }
 0x18e   : > { %1029 = vst.msk [vmem:[#allocation2 + $0x14] sm:$0xff] %vm2593_vm2, %v2408_v2 }
 0x18f   : > { %v1109_v4 = vld [vmem:[#allocation2 + $0x8] sm:$0xff] }
 0x190   : > { %1206 = vrot.lane.b32.xlu1 %v2801_v57, %s2496_s13  ;;  %1154 = vrot.lane.b32.xlu0 %v2801_v57, %s2497_s14 }
 0x194   : > { %1152 = vrot.lane.b32.xlu1 %v2788_v24, %s2497_s14  ;;  %1088 = vrot.lane.b32.xlu0 %v1082_v3, %s2498_s15 }
 0x195   : > { %v1142_v1 = vld [vmem:[#allocation2 + $0x14] sm:$0xff] }
 0x196   : > { %1145 = vst.msk [vmem:[#allocation3 + $0x70] sm:$0xff] %vm2593_vm2, %v1142_v1  ;;  %v1084_v7 = vld [vmem:[#allocation2 + $0x10] sm:$0xff]  ;;  %v1111_v8 = vld [vmem:[#allocation2 + $0x18] sm:$0xf] }
 0x198   : > { %1118 = vrot.lane.b32.xlu0 %v1109_v4, %s2499_s16  ;;  %1090 = vrot.lane.b32.xlu1 %v1109_v4, %s2498_s15 }
 0x19c   : > { %1036 = vrot.lane.b32.xlu0 %v1082_v3, %s2500_s17  ;;  %1116 = vrot.lane.b32.xlu1 %v1082_v3, %s2499_s16 }
 0x1a0   : > { %1234 = vrot.lane.b32.xlu0 %v1142_v1, %s2494_s11  ;;  %1038 = vrot.lane.b32.xlu1 %v1109_v4, %s2500_s17 }
 0x1a4   : > { %1208 = vrot.lane.b32.xlu0 %v1142_v1, %s2496_s13  ;;  %1062 = vrot.lane.b32.xlu1 %v1082_v3, %s2501_s18 }
 0x1a8   : > { %1092 = vrot.lane.b32.xlu0 %v1084_v7, %s2498_s15  ;;  %1182 = vrot.lane.b32.xlu1 %v1142_v1, %s2495_s12 }
 0x1ac   : > { %1040 = vrot.lane.b32.xlu0 %v1084_v7, %s2500_s17  ;;  %1156 = vrot.lane.b32.xlu1 %v1142_v1, %s2497_s14 }
 0x1b0   : > { %1064 = vrot.lane.b32.xlu0 %v1109_v4, %s2501_s18  ;;  %1120 = vrot.lane.b32.xlu1 %v1084_v7, %s2499_s16 }
 0x1b4   : > { %1122 = vrot.lane.b32.xlu0 %v1111_v8, %s2499_s16  ;;  %1066 = vrot.lane.b32.xlu1 %v1084_v7, %s2501_s18 }
 0x1b8   : > { %1281 = vperm.xlu1 %2430, %v1278_v55  }
 0x1e6   : > { %v1231_v9 = vpop.permute.xlu0 %1230 }
 0x1e7   : > { %v1236_v62 = vrot.slane %v1231_v9, 4 }
 0x1fa   : > { %v1233_v10 = vpop.permute.xlu1 %1232  ;;  %v2847_v11 = vpop.permute.xlu0 %1180 }
 0x1fb   : > { %v1237_v12 = vrot.slane %v1233_v10, 4  ;;  %v1185_v23 = vrot.slane %v2847_v11, 4 }
 0x1fd   : > { %v1239_v15 = vsel %vm430_vm0, %v1236_v62, %v1237_v12 }
 0x1fe   : > { %v1240_v53 = vsel %vm635_vm3, %v1231_v9, %v1239_v15  ;;  %v1179_v59 = vpop.permute.xlu1 %1178  ;;  %v1205_v18 = vpop.permute.xlu0 %1204 }
 0x1ff   : > { %v1184_v19 = vrot.slane %v1179_v59, 4  ;;  %v2353_v20 = vcombine.high %v1240_v53, %v1240_v53  ;;  %v2352_v21 = vcombine.low %v1240_v53, %v1240_v53  ;;  %v1210_v17 = vrot.slane %v1205_v18, 4 }
 0x201   : > { %2358 = vmatprep.subr.msk.bf16.mxu1 %vm430_vm0, %v2353_v20  ;;  %v1423_v16 = vsel %vm430_vm0, %v2352_v21, 0  ;;  %v1187_v28 = vsel %vm430_vm0, %v1184_v19, %v1185_v23 }
 0x202   : > { %v2854_v25 = vpop.permute.xlu1 %1206  ;;  %v2856_v27 = vpop.permute.xlu0 %1154  ;;  %1447 = vmatpush1.bf16.msra.mxu1 %v1423_v16  ;;  %v1188_v32 = vsel %vm581_vm4, %v1179_v59, %v1187_v28 }
 0x203   : > { %v1211_v13 = vrot.slane %v2854_v25, 4  ;;  %v1159_v36 = vrot.slane %v2856_v27, 4 }
 0x205   : > { %v1213_v30 = vsel %vm430_vm0, %v1210_v17, %v1211_v13 }
 0x206   : > { %v1214_v34 = vsel %vm608_vm5, %v1205_v18, %v1213_v30  ;;  %v1153_v33 = vpop.permute.xlu1 %1152  ;;  %v1089_v35 = vpop.permute.xlu0 %1088 }
 0x207   : > { %v1158_v14 = vrot.slane %v1153_v33, 4  ;;  %v2347_v37 = vcombine.high %v1188_v32, %v1214_v34  ;;  %v2346_v31 = vcombine.low %v1188_v32, %v1214_v34  ;;  %v1094_v50 = vrot.slane %v1089_v35, 4 }
 0x209   : > { %v1161_v38 = vsel %vm430_vm0, %v1158_v14, %v1159_v36  ;;  %1448 = vmatprep.subr.bf16.mxu1 %v2347_v37 }
 0x20a   : > { %v1162_v40 = vsel %vm554_vm6, %v1153_v33, %v1161_v38  ;;  %v2870_v43 = vpop.permute.xlu1 %1090  ;;  %v2872_v44 = vpop.permute.xlu0 %1118  ;;  %1449 = vmatpush1.bf16.msra.mxu1 %v2346_v31 }
 0x20b   : > { %v1095_v46 = vrot.slane %v2870_v43, 4  ;;  %v2341_v47 = vcombine.high %v2788_v24, %v1162_v40  ;;  %v2340_v49 = vcombine.low %v2788_v24, %v1162_v40  ;;  %v1125_v54 = vrot.slane %v2872_v44, 4 }
 0x20d   : > { %1450 = vmatprep.subr.bf16.mxu1 %v2341_v47  ;;  %v1097_v41 = vsel %vm430_vm0, %v1094_v50, %v1095_v46 }
 0x20e   : > { %v1117_v48 = vpop.permute.xlu1 %1116  ;;  %v2877_v51 = vpop.permute.xlu0 %1036  ;;  %1451 = vmatpush1.bf16.msra.mxu1 %v2340_v49  ;;  %v1098_v39 = vsel %vm488_vm7, %v1089_v35, %v1097_v41 }
 0x20f   : > { %v1124_v56 = vrot.slane %v1117_v48, 4  ;;  %v1042_v14 = vrot.slane %v2877_v51, 4 }
 0x211   : > { %v1128_v58 = vsel %vm430_vm0, %v1124_v56, %v1125_v54 }
 0x212   : > { %v1129_v45 = vsel %vm520_vm8, %v1117_v48, %v1128_v58  ;;  %v2886_v24 = vpop.permute.xlu1 %1038  ;;  %v1235_v61 = vpop.permute.xlu0 %1234 }
 0x213   : > { %v1238_v63 = vrot.slane %v1235_v61, 4  ;;  %v2335_v0 = vcombine.high %v1098_v39, %v1129_v45  ;;  %v2334_v2 = vcombine.low %v1098_v39, %v1129_v45  ;;  %v1043_v28 = vrot.slane %v2886_v24, 4 }
 0x215   : > { %v1241_v3 = vsel %vm430_vm0, %v1237_v12, %v1238_v63  ;;  %v1243_v1 = vsel %vm635_vm3, %v1235_v61, %v1238_v63  ;;  %1452 = vmatprep.subr.bf16.mxu1 %v2335_v0  ;;  %v1045_v31 = vsel %vm430_vm0, %v1042_v14, %v1043_v28 }
 0x216   : > { %v1242_v4 = vsel %vm635_vm3, %v1233_v10, %v1241_v3  ;;  %1249 = vst.msk [vmem:[#allocation3 + $0xd0] sm:$0xff] %vm2593_vm2, %v1243_v1  ;;  %v1063_v7 = vpop.permute.xlu1 %1062  ;;  %v1209_v8 = vpop.permute.xlu0 %1208  ;;  %1453 = vmatpush1.bf16.msra.mxu1 %v2334_v2 }
 0x217   : > { %v1212_v55 = vrot.slane %v1209_v8, 4  ;;  %v2355_v9 = vcombine.high %v1242_v4, %v1242_v4  ;;  %v2354_v62 = vcombine.low %v1242_v4, %v1242_v4  ;;  %v1068_v38 = vrot.slane %v1063_v7, 4 }
 0x219   : > { %v1217_v15 = vsel %vm608_vm5, %v1209_v8, %v1212_v55  ;;  %2360 = vmatprep.subr.msk.bf16.mxu0 %vm430_vm0, %v2355_v9  ;;  %v1429_v12 = vsel %vm430_vm0, %v2354_v62, 0  ;;  %v1215_v59 = vsel %vm430_vm0, %v1211_v13, %v1212_v55 }
 0x21a   : > { %1223 = vst.msk [vmem:[#allocation3 + $0xb8] sm:$0xff] %vm2593_vm2, %v1217_v15  ;;  %v1183_v53 = vpop.permute.xlu1 %1182  ;;  %v1093_v10 = vpop.permute.xlu0 %1092  ;;  %1488 = vmatpush1.bf16.msra.mxu0 %v1429_v12  ;;  %v1216_v17 = vsel %vm608_vm5, %v2854_v25, %v1215_v59 }
 0x21b   : > { %v1186_v18 = vrot.slane %v1183_v53, 4  ;;  %v1096_v19 = vrot.slane %v1093_v10, 4 }
 0x21d   : > { %v1189_v20 = vsel %vm430_vm0, %v1185_v23, %v1186_v18  ;;  %v1191_v21 = vsel %vm581_vm4, %v1183_v53, %v1186_v18  ;;  %v1101_v16 = vsel %vm488_vm7, %v1093_v10, %v1096_v19  ;;  %v1099_v40 = vsel %vm430_vm0, %v1095_v46, %v1096_v19  ;;  %v1277_v39 = vld [vmem:[#allocation3 + $0xd0] sm:$0xff]  ;;  %v1250_v53 = vld [vmem:[%s386_s24] sm:$0xf] }
 0x21e   : > { %v1190_v30 = vsel %vm581_vm4, %v2847_v11, %v1189_v20  ;;  %1197 = vst.msk [vmem:[#allocation3 + $0xa0] sm:$0xff] %vm2593_vm2, %v1191_v21  ;;  %1107 = vst.msk [vmem:[#allocation3 + $0x40] sm:$0xff] %vm2593_vm2, %v1101_v16  ;;  %v1157_v13 = vpop.permute.xlu1 %1156  ;;  %v1041_v23 = vpop.permute.xlu0 %1040  ;;  %v1046_v46 = vsel %vm432_vm9, %v2877_v51, %v1045_v31  ;;  %v1100_v45 = vsel %vm488_vm7, %v2870_v43, %v1099_v40 }
 0x21f   : > { %v1160_v32 = vrot.slane %v1157_v13, 4  ;;  %v1044_v34 = vrot.slane %v1041_v23, 4  ;;  %v2349_v33 = vcombine.high %v1190_v30, %v1216_v17  ;;  %v2348_v35 = vcombine.low %v1190_v30, %v1216_v17 }
 0x220   : > { %v2357_v8 = vcombine.high %v1277_v39, %v1277_v39  ;;  %v2356_v55 = vcombine.low %v1277_v39, %v1277_v39 }
 0x221   : > { %v1163_v25 = vsel %vm430_vm0, %v1159_v36, %v1160_v32  ;;  %v1165_v11 = vsel %vm554_vm6, %v1157_v13, %v1160_v32  ;;  %v1049_v37 = vsel %vm432_vm9, %v1041_v23, %v1044_v34  ;;  %1489 = vmatprep.subr.bf16.mxu0 %v2349_v33  ;;  %v1047_v61 = vsel %vm430_vm0, %v1043_v28, %v1044_v34 }
 0x222   : > { %v1164_v47 = vsel %vm554_vm6, %v2856_v27, %v1163_v25  ;;  %1171 = vst.msk [vmem:[#allocation3 + $0x88] sm:$0xff] %vm2593_vm2, %v1165_v11  ;;  %1055 = vst.msk [vmem:[#allocation3 + $0x10] sm:$0xff] %vm2593_vm2, %v1049_v37  ;;  %v1121_v36 = vpop.permute.xlu1 %1120  ;;  %v1065_v49 = vpop.permute.xlu0 %1064  ;;  %1490 = vmatpush1.bf16.msra.mxu0 %v2348_v35  ;;  %v1048_v62 = vsel %vm432_vm9, %v2886_v24, %v1047_v61  ;;  %v1435_v24 = vsel %vm430_vm0, %v2356_v55, 0 }
 0x223   : > { %v1126_v50 = vrot.slane %v1121_v36, 4  ;;  %v1069_v48 = vrot.slane %v1065_v49, 4  ;;  %v2343_v41 = vcombine.high %v2801_v57, %v1164_v47  ;;  %v2342_v56 = vcombine.low %v2801_v57, %v1164_v47 }
 0x225   : > { %v1130_v27 = vsel %vm430_vm0, %v1125_v54, %v1126_v50  ;;  %v1071_v58 = vsel %vm430_vm0, %v1068_v38, %v1069_v48  ;;  %1491 = vmatprep.subr.bf16.mxu0 %v2343_v41  ;;  %v2448_v18 = vld [vmem:[#allocation3 + $0xa4] ss:$24 sps:$4 sm:$0xff]   ;;  %v2450_v19 = vld [vmem:[#allocation3 + $0xa0] ss:$24 sps:$4 sm:$0xff]  }
 0x226   : > { %v1131_v57 = vsel %vm520_vm8, %v2872_v44, %v1130_v27  ;;  %v1072_v63 = vsel %vm461_vm10, %v1063_v7, %v1071_v58  ;;  %v1067_v51 = vpop.permute.xlu1 %1066  ;;  %v1123_v0 = vpop.permute.xlu0 %1122  ;;  %1492 = vmatpush1.bf16.msra.mxu0 %v2342_v56 }
 0x227   : > { %v1070_v2 = vrot.slane %v1067_v51, 4  ;;  %v1127_v3 = vrot.slane %v1123_v0, 4  ;;  %v2329_v54 = vcombine.high %v1046_v46, %v1072_v63  ;;  %v2337_v1 = vcombine.high %v1100_v45, %v1131_v57 }
 0x228   : > { %v2328_v4 = vcombine.low %v1046_v46, %v1072_v63  ;;  %v2336_v43 = vcombine.low %v1100_v45, %v1131_v57 }
 0x229   : > { %v1073_v9 = vsel %vm430_vm0, %v1069_v48, %v1070_v2  ;;  %v1075_v44 = vsel %vm461_vm10, %v1067_v51, %v1070_v2  ;;  %v1132_v7 = vsel %vm430_vm0, %v1126_v50, %v1127_v3  ;;  %1454 = vmatprep.subr.bf16.mxu1 %v2329_v54  ;;  %1493 = vmatprep.subr.bf16.mxu0 %v2337_v1  ;;  %v2451_v20 = vld [vmem:[#allocation3 + $0x74] ss:$24 sps:$4 sm:$0xff]   ;;  %v2453_v21 = vld [vmem:[#allocation3 + $0x70] ss:$24 sps:$4 sm:$0xff]   ;;  %v1850_v1 = vld [vmem:[%s402_s29] sm:$0xff] }
 0x22a   : > { %v1074_v15 = vsel %vm461_vm10, %v1065_v49, %v1073_v9  ;;  %1081 = vst.msk [vmem:[#allocation3 + $0x28] sm:$0xff] %vm2593_vm2, %v1075_v44  ;;  %v1133_v12 = vsel %vm520_vm8, %v1121_v36, %v1132_v7  ;;  %1455 = vmatpush1.bf16.msra.mxu1 %v2328_v4  ;;  %1494 = vmatpush1.bf16.msra.mxu0 %v2336_v43 }
 0x22b   : > { %1139 = vst.msk [vmem:[#allocation3 + $0x58] sm:$0xff] %vm2593_vm2, %v1133_v12  ;;  %2362 = vmatprep.subr.msk.bf16.mxu1 %vm430_vm0, %v2357_v8  ;;  %v2331_v10 = vcombine.high %v1048_v62, %v1074_v15  ;;  %v2330_v59 = vcombine.low %v1048_v62, %v1074_v15 }
 0x22d   : > { %2359 = vmatmul.mubr.msk.bf16.vlgmr.msra.gmra.mxu1 %vm815_vm11, %v1250_v53  ;;  %1495 = vmatprep.subr.bf16.mxu0 %v2331_v10 }
 0x22e   : > { %1496 = vmatpush1.bf16.msra.mxu0 %v2330_v59  ;;  %1529 = vmatpush1.bf16.msra.mxu1 %v1435_v24 }
 0x22f   : > { %1530 = vmatprep.subr.bf16.mxu1 %v2448_v18  ;;  %1554 = vmatprep.mubr.bf16.mxu1 %v2502_v6 }
 0x231   : > { %2361 = vmatmul.mubr.msk.bf16.vlgmr.msra.gmra.mxu0 %vm815_vm11, %v1250_v53  ;;  %v2457_v17 = vld [vmem:[#allocation3 + $0x14] ss:$24 sps:$4 sm:$0xff]   ;;  %v2459_v30 = vld [vmem:[#allocation3 + $0x10] ss:$24 sps:$4 sm:$0xff]  }
 0x232   : > { %1531 = vmatpush1.bf16.msra.mxu1 %v2450_v19  ;;  %2044 = vmatprep.mubr.bf16.mxu0 %v2502_v6  ;;  %v2454_v16 = vld [vmem:[#allocation3 + $0x44] ss:$24 sps:$4 sm:$0xff]   ;;  %v2456_v28 = vld [vmem:[#allocation3 + $0x40] ss:$24 sps:$4 sm:$0xff]  }
 0x233   : > { %1532 = vmatprep.subr.bf16.mxu1 %v2451_v20  ;;  %v1282_v13 = vpop.permute.xlu1 %1281 }
 0x236   : > { %1533 = vmatpush1.bf16.msra.mxu1 %v2453_v21 }
 0x237   : > { %1534 = vmatprep.subr.bf16.mxu1 %v2454_v16 }
 0x23a   : > { %1535 = vmatpush1.bf16.msra.mxu1 %v2456_v28 }
 0x23b   : > { %1536 = vmatprep.subr.bf16.mxu1 %v2457_v17 }
 0x23e   : > { %1537 = vmatpush1.bf16.msra.mxu1 %v2459_v30 }
 0x241   : > { %2363 = vmatmul.mubr.msk.bf16.vlgmr.msra.gmra.mxu1 %vm815_vm11, %v1250_v53 }
 0x242   : > { %2085 = vmatprep.mubr.bf16.mxu1 %v2502_v6 }
 0x2ed   : > { %v1474_v23 = vpop.f32.mrf.mxu1 }
 0x2ee   : > { %v1475_v32 = vadd.f32 %v1474_v23, %v1282_v13 }
 0x2ef   : > { %v1476_v34 = vpop.f32.mrf.mxu1 }
 0x2f0   : > { %v1563_v33 = vmax.f32 %v1475_v32, 0.0  ;;  %v1477_v35 = vadd.f32 %v1476_v34, %v1282_v13 }
 0x2f1   : > { %v1478_v14 = vpop.f32.mrf.mxu1  ;;  %v1515_v25 = vpop.f32.mrf.mxu0 }
 0x2f2   : > { %v1564_v11 = vmax.f32 %v1477_v35, 0.0  ;;  %v1516_v37 = vadd.f32 %v1515_v25, %v1282_v13  ;;  %v1569_v40 = vmul.f32 %v1563_v33, %v2782_v26 }
 0x2f3   : > { %v1479_v31 = vpop.f32.mrf.mxu1  ;;  %v1517_v38 = vpop.f32.mrf.mxu0 }
 0x2f4   : > { %v1570_v47 = vmul.f32 %v1564_v11, %v2784_v29  ;;  %v1565_v36 = vmax.f32 %v1516_v37, 0.0  ;;  %v1518_v49 = vadd.f32 %v1517_v38, %v1282_v13 }
 0x2f5   : > { %v1519_v50 = vpop.f32.mrf.mxu0 }
 0x2f6   : > { %v2966_v48 = vpack.c.bf16 %v1570_v47, %v1569_v40  ;;  %v1566_v41 = vmax.f32 %v1518_v49, 0.0  ;;  %v1571_v46 = vmul.f32 %v1565_v36, %v2793_v22 }
 0x2f7   : > { %v1520_v56 = vpop.f32.mrf.mxu0 }
 0x2f8   : > { %1599 = vst [vmem:[#allocation2 + $0x4] sm:$0xff] %v2966_v48  ;;  %v1572_v27 = vmul.f32 %v1566_v41, %v2795_v42  ;;  %1802 = vrot.lane.b32.xlu0 %v2966_v48, %s2494_s11 }
 0x2fa   : > { %v2973_v58 = vpack.c.bf16 %v1572_v27, %v1571_v46 }
 0x2fc   : > { %1600 = vst [vmem:[#allocation2 + $0xc] sm:$0xff] %v2973_v58  ;;  %1804 = vrot.lane.b32.xlu1 %v2973_v58, %s2494_s11  ;;  %1750 = vrot.lane.b32.xlu0 %v2966_v48, %s2495_s12 }
 0x2ff   : > { %v1654_v57 = vld [vmem:[#allocation2] sm:$0xff] }
 0x300   : > { %1752 = vrot.lane.b32.xlu1 %v2973_v58, %s2495_s12  ;;  %1776 = vrot.lane.b32.xlu0 %v2966_v48, %s2496_s13 }
 0x301   : > { %v1556_v26 = vpop.f32.mrf.mxu1 }
 0x302   : > { %v1557_v29 = vadd.f32 %v1556_v26, %v1282_v13 }
 0x303   : > { %v1558_v22 = vpop.f32.mrf.mxu1  ;;  %v1655_v3 = vld [vmem:[#allocation2 + $0x8] sm:$0xff] }
 0x304   : > { %v1567_v42 = vmax.f32 %v1557_v29, 0.0  ;;  %v1559_v39 = vadd.f32 %v1558_v22, %v1282_v13  ;;  %1778 = vrot.lane.b32.xlu1 %v2973_v58, %s2496_s13  ;;  %1724 = vrot.lane.b32.xlu0 %v2966_v48, %s2497_s14 }
 0x305   : > { %v1560_v45 = vpop.f32.mrf.mxu1 }
 0x306   : > { %v1568_v61 = vmax.f32 %v1559_v39, 0.0  ;;  %v1573_v51 = vmul.f32 %v1567_v42, %v2799_v52 }
 0x307   : > { %v1561_v63 = vpop.f32.mrf.mxu1 }
 0x308   : > { %v1574_v0 = vmul.f32 %v1568_v61, %v2803_v60  ;;  %1726 = vrot.lane.b32.xlu1 %v2973_v58, %s2497_s14  ;;  %1660 = vrot.lane.b32.xlu0 %v1654_v57, %s2498_s15 }
 0x30a   : > { %v2411_v2 = vpack.c.bf16 %v1574_v0, %v1573_v51 }
 0x30c   : > { %1601 = vst.msk [vmem:[#allocation2 + $0x14] sm:$0xff] %vm2593_vm2, %v2411_v2  ;;  %1662 = vrot.lane.b32.xlu1 %v1655_v3, %s2498_s15  ;;  %1688 = vrot.lane.b32.xlu0 %v1654_v57, %s2499_s16 }
 0x310   : > { %1690 = vrot.lane.b32.xlu1 %v1655_v3, %s2499_s16  ;;  %1608 = vrot.lane.b32.xlu0 %v1654_v57, %s2500_s17 }
 0x313   : > { %v1798_v52 = vld [vmem:[#allocation2 + $0x14] sm:$0xff] }
 0x314   : > { %1610 = vrot.lane.b32.xlu1 %v1655_v3, %s2500_s17  ;;  %1634 = vrot.lane.b32.xlu0 %v1654_v57, %s2501_s18  ;;  %1717 = vst.msk [vmem:[#allocation3 + $0x70] sm:$0xff] %vm2593_vm2, %v1798_v52  ;;  %v1656_v60 = vld [vmem:[#allocation2 + $0x10] sm:$0xff]  ;;  %v1683_v54 = vld [vmem:[#allocation2 + $0x18] sm:$0xf] }
 0x318   : > { %1636 = vrot.lane.b32.xlu1 %v1655_v3, %s2501_s18  ;;  %1806 = vrot.lane.b32.xlu0 %v1798_v52, %s2494_s11 }
 0x31c   : > { %1780 = vrot.lane.b32.xlu0 %v1798_v52, %s2496_s13  ;;  %1754 = vrot.lane.b32.xlu1 %v1798_v52, %s2495_s12  ;;  %s390_s13 = scalar_lea.vmem %s3168_s4, %s2687_s23 }
 0x320   : > { %1728 = vrot.lane.b32.xlu1 %v1798_v52, %s2497_s14  ;;  %1664 = vrot.lane.b32.xlu0 %v1656_v60, %s2498_s15  ;;  %s2412_s14 = smul.u32 48, %s3176_s28 }
 0x324   : > { %1692 = vrot.lane.b32.xlu1 %v1656_v60, %s2499_s16  ;;  %1694 = vrot.lane.b32.xlu0 %v1683_v54, %s2499_s16 }
 0x328   : > { %1638 = vrot.lane.b32.xlu0 %v1656_v60, %s2501_s18  ;;  %1612 = vrot.lane.b32.xlu1 %v1656_v60, %s2500_s17  ;;  %s407_s17 = scalar_lea.vmem %s3172_s8, %s2412_s14 }
 0x32c   : > { %1853 = vperm.xlu1 %2430, %v1850_v1  }
 0x36a   : > { %v1803_v4 = vpop.permute.xlu0 %1802 }
 0x36b   : > { %v1808_v55 = vrot.slane %v1803_v4, 4 }
 0x36e   : > { %v3017_v43 = vpop.permute.xlu1 %1804  ;;  %v1751_v8 = vpop.permute.xlu0 %1750 }
 0x36f   : > { %v1809_v9 = vrot.slane %v3017_v43, 4  ;;  %v1756_v12 = vrot.slane %v1751_v8, 4 }
 0x371   : > { %v1811_v44 = vsel %vm430_vm0, %v1808_v55, %v1809_v9 }
 0x372   : > { %v1812_v7 = vsel %vm635_vm3, %v1803_v4, %v1811_v44  ;;  %v3024_v62 = vpop.permute.xlu1 %1752  ;;  %v1777_v15 = vpop.permute.xlu0 %1776 }
 0x373   : > { %v1757_v53 = vrot.slane %v3024_v62, 4  ;;  %v2392_v10 = vcombine.high %v1812_v7, %v1812_v7  ;;  %v2391_v59 = vcombine.low %v1812_v7, %v1812_v7  ;;  %v1782_v16 = vrot.slane %v1777_v15, 4 }
 0x375   : > { %v1759_v24 = vsel %vm430_vm0, %v1756_v12, %v1757_v53  ;;  %2397 = vmatprep.subr.msk.bf16.mxu0 %vm430_vm0, %v2392_v10  ;;  %v1995_v18 = vsel %vm430_vm0, %v2391_v59, 0 }
 0x376   : > { %v1760_v19 = vsel %vm581_vm4, %v1751_v8, %v1759_v24  ;;  %v3033_v20 = vpop.permute.xlu1 %1778  ;;  %v1725_v21 = vpop.permute.xlu0 %1724  ;;  %2019 = vmatpush1.bf16.msra.mxu0 %v1995_v18 }
 0x377   : > { %v1783_v28 = vrot.slane %v3033_v20, 4  ;;  %v1730_v32 = vrot.slane %v1725_v21, 4 }
 0x379   : > { %v1785_v17 = vsel %vm430_vm0, %v1782_v16, %v1783_v28 }
 0x37a   : > { %v1786_v30 = vsel %vm608_vm5, %v1777_v15, %v1785_v17  ;;  %v3038_v13 = vpop.permute.xlu1 %1726  ;;  %v1661_v23 = vpop.permute.xlu0 %1660  ;;  %v3103_v17 = vld [vmem:[%s390_s13] sm:$0xf] }
 0x37b   : > { %v1731_v34 = vrot.slane %v3038_v13, 4  ;;  %v2385_v33 = vcombine.low %v1760_v19, %v1786_v30  ;;  %v2386_v35 = vcombine.high %v1760_v19, %v1786_v30  ;;  %v1666_v31 = vrot.slane %v1661_v23, 4 }
 0x37d   : > { %v1733_v14 = vsel %vm430_vm0, %v1730_v32, %v1731_v34  ;;  %2020 = vmatprep.subr.bf16.mxu0 %v2386_v35 }
 0x37e   : > { %v1734_v25 = vsel %vm554_vm6, %v1725_v21, %v1733_v14  ;;  %v3045_v11 = vpop.permute.xlu1 %1662  ;;  %v1689_v37 = vpop.permute.xlu0 %1688  ;;  %2021 = vmatpush1.bf16.msra.mxu0 %v2385_v33 }
 0x37f   : > { %v1667_v38 = vrot.slane %v3045_v11, 4  ;;  %v2379_v40 = vcombine.low %v2966_v48, %v1734_v25  ;;  %v2380_v47 = vcombine.high %v2966_v48, %v1734_v25  ;;  %v1696_v56 = vrot.slane %v1689_v37, 4 }
 0x381   : > { %v1669_v36 = vsel %vm430_vm0, %v1666_v31, %v1667_v38  ;;  %2022 = vmatprep.subr.bf16.mxu0 %v2380_v47 }
 0x382   : > { %v1670_v49 = vsel %vm488_vm7, %v1661_v23, %v1669_v36  ;;  %v3054_v50 = vpop.permute.xlu1 %1690  ;;  %v1609_v41 = vpop.permute.xlu0 %1608  ;;  %2023 = vmatpush1.bf16.msra.mxu0 %v2379_v40 }
 0x383   : > { %v1697_v46 = vrot.slane %v3054_v50, 4  ;;  %v1614_v22 = vrot.slane %v1609_v41, 4 }
 0x385   : > { %v1700_v27 = vsel %vm430_vm0, %v1696_v56, %v1697_v46 }
 0x386   : > { %v1701_v48 = vsel %vm520_vm8, %v1689_v37, %v1700_v27  ;;  %v3061_v26 = vpop.permute.xlu1 %1610  ;;  %v1635_v29 = vpop.permute.xlu0 %1634 }
 0x387   : > { %v1615_v42 = vrot.slane %v3061_v26, 4  ;;  %v2373_v39 = vcombine.low %v1670_v49, %v1701_v48  ;;  %v2374_v45 = vcombine.high %v1670_v49, %v1701_v48  ;;  %v1640_v0 = vrot.slane %v1635_v29, 4 }
 0x389   : > { %v1617_v61 = vsel %vm430_vm0, %v1614_v22, %v1615_v42  ;;  %2024 = vmatprep.subr.bf16.mxu0 %v2374_v45 }
 0x38a   : > { %v1618_v57 = vsel %vm432_vm9, %v1609_v41, %v1617_v61  ;;  %v3068_v63 = vpop.permute.xlu1 %1636  ;;  %v1807_v51 = vpop.permute.xlu0 %1806  ;;  %2025 = vmatpush1.bf16.msra.mxu0 %v2373_v39 }
 0x38b   : > { %v1641_v2 = vrot.slane %v3068_v63, 4  ;;  %v1810_v3 = vrot.slane %v1807_v51, 4 }
 0x38d   : > { %v1643_v52 = vsel %vm430_vm0, %v1640_v0, %v1641_v2  ;;  %v1813_v60 = vsel %vm430_vm0, %v1809_v9, %v1810_v3  ;;  %v1815_v54 = vsel %vm635_vm3, %v1807_v51, %v1810_v3 }
 0x38e   : > { %v1644_v1 = vsel %vm461_vm10, %v1635_v29, %v1643_v52  ;;  %v1814_v4 = vsel %vm635_vm3, %v3017_v43, %v1813_v60  ;;  %1821 = vst.msk [vmem:[#allocation3 + $0xd0] sm:$0xff] %vm2593_vm2, %v1815_v54  ;;  %v1755_v8 = vpop.permute.xlu1 %1754  ;;  %v1781_v55 = vpop.permute.xlu0 %1780 }
 0x38f   : > { %v1758_v44 = vrot.slane %v1755_v8, 4  ;;  %v1784_v7 = vrot.slane %v1781_v55, 4  ;;  %v2367_v15 = vcombine.low %v1618_v57, %v1644_v1  ;;  %v2368_v12 = vcombine.high %v1618_v57, %v1644_v1 }
 0x390   : > { %v2394_v9 = vcombine.high %v1814_v4, %v1814_v4  ;;  %v2393_v10 = vcombine.low %v1814_v4, %v1814_v4 }
 0x391   : > { %v1761_v59 = vsel %vm430_vm0, %v1757_v53, %v1758_v44  ;;  %v1763_v43 = vsel %vm581_vm4, %v1755_v8, %v1758_v44  ;;  %v1787_v24 = vsel %vm430_vm0, %v1783_v28, %v1784_v7  ;;  %v1789_v18 = vsel %vm608_vm5, %v1781_v55, %v1784_v7  ;;  %2026 = vmatprep.subr.bf16.mxu0 %v2368_v12 }
 0x392   : > { %v1762_v19 = vsel %vm581_vm4, %v3024_v62, %v1761_v59  ;;  %1769 = vst.msk [vmem:[#allocation3 + $0xa0] sm:$0xff] %vm2593_vm2, %v1763_v43  ;;  %v1788_v21 = vsel %vm608_vm5, %v3033_v20, %v1787_v24  ;;  %1795 = vst.msk [vmem:[#allocation3 + $0xb8] sm:$0xff] %vm2593_vm2, %v1789_v18  ;;  %v1729_v53 = vpop.permute.xlu1 %1728  ;;  %v1665_v16 = vpop.permute.xlu0 %1664  ;;  %2399 = vmatprep.subr.msk.bf16.mxu1 %vm430_vm0, %v2394_v9  ;;  %2027 = vmatpush1.bf16.msra.mxu0 %v2367_v15  ;;  %v2001_v28 = vsel %vm430_vm0, %v2393_v10, 0 }
 0x393   : > { %v1732_v30 = vrot.slane %v1729_v53, 4  ;;  %v1668_v62 = vrot.slane %v1665_v16, 4  ;;  %2060 = vmatpush1.bf16.msra.mxu1 %v2001_v28  ;;  %v2387_v23 = vcombine.low %v1762_v19, %v1788_v21  ;;  %v2388_v32 = vcombine.high %v1762_v19, %v1788_v21 }
 0x395   : > { %v1735_v20 = vsel %vm430_vm0, %v1731_v34, %v1732_v30  ;;  %v1737_v33 = vsel %vm554_vm6, %v1729_v53, %v1732_v30  ;;  %v1671_v35 = vsel %vm430_vm0, %v1667_v38, %v1668_v62  ;;  %v1673_v14 = vsel %vm488_vm7, %v1665_v16, %v1668_v62  ;;  %v1849_v25 = vld [vmem:[#allocation3 + $0xd0] sm:$0xff]  ;;  %2398 = vmatmul.mubr.msk.bf16.vlgmr.msra.gmra.mxu0 %vm815_vm11, %v3103_v17 }
 0x396   : > { %v1736_v37 = vsel %vm554_vm6, %v3038_v13, %v1735_v20  ;;  %1743 = vst.msk [vmem:[#allocation3 + $0x88] sm:$0xff] %vm2593_vm2, %v1737_v33  ;;  %v1672_v34 = vsel %vm488_vm7, %v3045_v11, %v1671_v35  ;;  %1679 = vst.msk [vmem:[#allocation3 + $0x40] sm:$0xff] %vm2593_vm2, %v1673_v14  ;;  %v1693_v31 = vpop.permute.xlu1 %1692  ;;  %v1695_v38 = vpop.permute.xlu0 %1694  ;;  %v2396_v40 = vcombine.high %v1849_v25, %v1849_v25  ;;  %2061 = vmatprep.subr.bf16.mxu1 %v2388_v32 }
 0x397   : > { %v2395_v47 = vcombine.low %v1849_v25, %v1849_v25  ;;  %v1698_v36 = vrot.slane %v1693_v31, 4  ;;  %v1699_v49 = vrot.slane %v1695_v38, 4  ;;  %2062 = vmatpush1.bf16.msra.mxu1 %v2387_v23  ;;  %v2381_v41 = vcombine.low %v2973_v58, %v1736_v37  ;;  %2126 = vmatprep.mubr.bf16.mxu0 %v2502_v6 }
 0x398   : > { %v2382_v13 = vcombine.high %v2973_v58, %v1736_v37  ;;  %2401 = vmatprep.subr.msk.bf16.mxu0 %vm430_vm0, %v2396_v40 }
 0x399   : > { %v2007_v11 = vsel %vm430_vm0, %v2395_v47, 0  ;;  %v1702_v56 = vsel %vm430_vm0, %v1697_v46, %v1698_v36  ;;  %v1704_v27 = vsel %vm430_vm0, %v1698_v36, %v1699_v49  ;;  %v2464_v6 = vld [vmem:[#allocation3 + $0xa4] ss:$24 sps:$4 sm:$0xff]   ;;  %v2462_v61 = vld [vmem:[#allocation3 + $0xa0] ss:$24 sps:$4 sm:$0xff]  }
 0x39a   : > { %2101 = vmatpush1.bf16.msra.mxu0 %v2007_v11  ;;  %2063 = vmatprep.subr.bf16.mxu1 %v2382_v13  ;;  %v1703_v48 = vsel %vm520_vm8, %v3054_v50, %v1702_v56  ;;  %v1705_v29 = vsel %vm520_vm8, %v1693_v31, %v1704_v27  ;;  %v1613_v58 = vpop.permute.xlu1 %1612  ;;  %v1639_v22 = vpop.permute.xlu0 %1638 }
 0x39b   : > { %1711 = vst.msk [vmem:[#allocation3 + $0x58] sm:$0xff] %vm2593_vm2, %v1705_v29  ;;  %v1616_v39 = vrot.slane %v1613_v58, 4  ;;  %v1642_v45 = vrot.slane %v1639_v22, 4  ;;  %2064 = vmatpush1.bf16.msra.mxu1 %v2381_v41  ;;  %v2375_v46 = vcombine.low %v1672_v34, %v1703_v48  ;;  %v2376_v57 = vcombine.high %v1672_v34, %v1703_v48  ;;  %2102 = vmatprep.subr.bf16.mxu0 %v2464_v6 }
 0x39d   : > { %v1619_v51 = vsel %vm430_vm0, %v1615_v42, %v1616_v39  ;;  %v1621_v50 = vsel %vm432_vm9, %v1613_v58, %v1616_v39  ;;  %v1645_v0 = vsel %vm430_vm0, %v1641_v2, %v1642_v45  ;;  %v1647_v3 = vsel %vm461_vm10, %v1639_v22, %v1642_v45  ;;  %v2467_v52 = vld [vmem:[#allocation3 + $0x74] ss:$24 sps:$4 sm:$0xff]   ;;  %2065 = vmatprep.subr.bf16.mxu1 %v2376_v57  ;;  %v2465_v42 = vld [vmem:[#allocation3 + $0x70] ss:$24 sps:$4 sm:$0xff]  }
 0x39e   : > { %2103 = vmatpush1.bf16.msra.mxu0 %v2462_v61  ;;  %v1620_v60 = vsel %vm432_vm9, %v3061_v26, %v1619_v51  ;;  %1627 = vst.msk [vmem:[#allocation3 + $0x10] sm:$0xff] %vm2593_vm2, %v1621_v50  ;;  %v1646_v54 = vsel %vm461_vm10, %v3068_v63, %v1645_v0  ;;  %1653 = vst.msk [vmem:[#allocation3 + $0x28] sm:$0xff] %vm2593_vm2, %v1647_v3 }
 0x39f   : > { %2104 = vmatprep.subr.bf16.mxu0 %v2467_v52  ;;  %2066 = vmatpush1.bf16.msra.mxu1 %v2375_v46  ;;  %v2369_v2 = vcombine.low %v1620_v60, %v1646_v54  ;;  %v2370_v1 = vcombine.high %v1620_v60, %v1646_v54 }
 0x3a1   : > { %2067 = vmatprep.subr.bf16.mxu1 %v2370_v1 }
 0x3a2   : > { %2105 = vmatpush1.bf16.msra.mxu0 %v2465_v42  ;;  %v2468_v4 = vld [vmem:[#allocation3 + $0x40] ss:$24 sps:$4 sm:$0xff]   ;;  %v2470_v8 = vld [vmem:[#allocation3 + $0x44] ss:$24 sps:$4 sm:$0xff]  }
 0x3a3   : > { %2068 = vmatpush1.bf16.msra.mxu1 %v2369_v2  ;;  %2106 = vmatprep.subr.bf16.mxu0 %v2470_v8 }
 0x3a5   : > { %v2473_v26 = vld [vmem:[#allocation3 + $0x14] ss:$24 sps:$4 sm:$0xff]   ;;  %v2471_v5 = vld [vmem:[#allocation3 + $0x10] ss:$24 sps:$4 sm:$0xff]  }
 0x3a6   : > { %2107 = vmatpush1.bf16.msra.mxu0 %v2468_v4  ;;  %2400 = vmatmul.mubr.msk.bf16.vlgmr.msra.gmra.mxu1 %vm815_vm11, %v3103_v17 }
 0x3a7   : > { %2108 = vmatprep.subr.bf16.mxu0 %v2473_v26  ;;  %v1854_v63 = vpop.permute.xlu1 %1853 }
 0x3aa   : > { %2109 = vmatpush1.bf16.msra.mxu0 %v2471_v5 }
 0x3ad   : > { %2402 = vmatmul.mubr.msk.bf16.vlgmr.msra.gmra.mxu0 %vm815_vm11, %v3103_v17 }
 0x455   : > { %v2046_v55 = vpop.f32.mrf.mxu0 }
 0x456   : > { %v2047_v44 = vadd.f32 %v2046_v55, %v1854_v63 }
 0x457   : > { %v2048_v7 = vpop.f32.mrf.mxu0 }
 0x458   : > { %2474 = vtanh.f32 %v2047_v44  ;;  %v2049_v15 = vadd.f32 %v2048_v7, %v1854_v63 }
 0x459   : > { %v2050_v12 = vpop.f32.mrf.mxu0 }
 0x45a   : > { %2476 = vtanh.f32 %v2049_v15 }
 0x45b   : > { %v2051_v9 = vpop.f32.mrf.mxu0 }
 0x465   : > { %v2475_v10 = vpop.eup %2474 }
 0x466   : > { %2141 = vst [vmem:[%s407_s17] sm:$0xff] %v2475_v10  ;;  %v2087_v59 = vpop.f32.mrf.mxu1 }
 0x467   : > { %v2477_v43 = vpop.eup %2476  ;;  %v2088_v24 = vadd.f32 %v2087_v59, %v1854_v63 }
 0x468   : > { %2142 = vst [vmem:[%s407_s17 + $0x8] sm:$0xff] %v2477_v43  ;;  %v2089_v18 = vpop.f32.mrf.mxu1 }
 0x469   : > { %2478 = vtanh.f32 %v2088_v24  ;;  %v2090_v19 = vadd.f32 %v2089_v18, %v1854_v63 }
 0x46a   : > { %v2091_v21 = vpop.f32.mrf.mxu1 }
 0x46b   : > { %2480 = vtanh.f32 %v2090_v19 }
 0x46c   : > { %v2092_v16 = vpop.f32.mrf.mxu1 }
 0x46d   : > { %v2128_v53 = vpop.f32.mrf.mxu0 }
 0x46e   : > { %v2129_v28 = vadd.f32 %v2128_v53, %v1854_v63 }
 0x46f   : > { %v2130_v17 = vpop.f32.mrf.mxu0 }
 0x470   : > { %2482 = vtanh.f32 %v2129_v28  ;;  %v2131_v30 = vadd.f32 %v2130_v17, %v1854_v63 }
 0x471   : > { %v2132_v62 = vpop.f32.mrf.mxu0 }
 0x472   : > { %2484 = vtanh.f32 %v2131_v30 }
 0x473   : > { %v2133_v23 = vpop.f32.mrf.mxu0 }
 0x476   : > { %v2479_v32 = vpop.eup %2478 }
 0x477   : > { %2143 = vst [vmem:[%s407_s17 + $0x10] sm:$0xff] %v2479_v32 }
 0x478   : > { %v2481_v20 = vpop.eup %2480 }
 0x479   : > { %2144 = vst [vmem:[%s407_s17 + $0x18] sm:$0xff] %v2481_v20 }
 0x47d   : > { %v2483_v33 = vpop.eup %2482 }
 0x47e   : > { %2145 = vst [vmem:[%s407_s17 + $0x20] sm:$0xff] %v2483_v33 }
 0x47f   : > { %v2485_v35 = vpop.eup %2484 }
 0x480   : > { %2147 = vst.msk [vmem:[%s407_s17 + $0x28] sm:$0xff] %vm2146_vm14, %v2485_v35 }
 0x481 PF: > { %s18_s27 = sadd.s32 1, %s2492_s27  }
 0x482   : > { %p15_p4 = scmp.ge.s32.totalorder %s18_s27, 4  }
 0x484   :  { %17 = sbr.rel (!%p15_p4) target bundleno = 1 (0x1), region = 100 }

</bundles_post_ra>
